<compile_context>
chip_gen: v7x
topology: tpu7x:2x2x1
jax: 0.10.0
libtpu: 0.0.40
codegen_flags: <defaults>
</compile_context>

<pallas_src>
import functools

import jax
import jax.numpy as jnp
import numpy as np
from jax import lax
from jax.experimental import pallas as pl
from jax.experimental.pallas import tpu as pltpu


def _round_up(v, m):
    return (v + m - 1) // m * m


def lstm_chunk_kernel(x_ref, wih_ref, whh_ref, b_ref,
                      out_ref, hn_ref, cn_ref,
                      gx_sc, h_sc, c_sc,
                      *, seq_len):
    """One (batch-group, time-chunk) grid step of the LSTM recurrence.

    x_ref   : (Tc*Bg, D)   chunk inputs, row = t_local*Bg + b_local
    wih_ref : (D, 4*Hp)    input->gate weights, gate order [i, f, o, g]
    whh_ref : (Hp, 4*Hp)   hidden->gate weights, gate order [i, f, o, g]
    b_ref   : (1, 4*Hp)    combined bias (f32)
    out_ref : (Tc*Bg, Hp)  chunk hidden outputs (f32, lane-dense)
    hn_ref  : (Bg, Hp)     final hidden state of this batch group
    cn_ref  : (Bg, Hp)     final cell state of this batch group
    gx_sc   : VMEM (Tc*Bg, 4*Hp) f32 — hoisted input projection
    h_sc/c_sc: VMEM (Bg, Hp) f32 — recurrent state carried across time chunks
    """
    Bg, Hp = hn_ref.shape
    Tc = out_ref.shape[0] // Bg
    ti = pl.program_id(1)
    t0 = ti * Tc

    # Reset the recurrent state at the first time chunk of every batch group.
    @pl.when(ti == 0)
    def _():
        h_sc[...] = jnp.zeros_like(h_sc)
        c_sc[...] = jnp.zeros_like(c_sc)

    # Hoisted input projection: one MXU matmul for the whole chunk.
    gx_sc[...] = (jnp.dot(x_ref[...], wih_ref[...],
                          preferred_element_type=jnp.float32)
                  + b_ref[...])

    def step(t, carry):
        h, c = carry
        row = pl.multiple_of(t * Bg, Bg)
        # TODO(synk): on v6e/v7x hold W_hh stationary in the MXU staging regs
        # (pltpu.matmul_push_rhs once + matmul_acc_lhs/matmul_pop per step)
        # instead of re-issuing jnp.dot with the weight tile every step.
        gates = (gx_sc[pl.ds(row, Bg), :]
                 + jnp.dot(h.astype(whh_ref.dtype), whh_ref[...],
                           preferred_element_type=jnp.float32))
        # Gate order [i, f, o, g]: one sigmoid over three gate blocks, one tanh.
        sig = jax.nn.sigmoid(gates[:, 0:3 * Hp])
        i_g = sig[:, 0 * Hp:1 * Hp]
        f_g = sig[:, 1 * Hp:2 * Hp]
        o_g = sig[:, 2 * Hp:3 * Hp]
        g_g = jnp.tanh(gates[:, 3 * Hp:4 * Hp])
        c_new = f_g * c + i_g * g_g
        h_new = o_g * jnp.tanh(c_new)
        # Padded time steps (t0 + t >= seq_len) must not advance the state.
        valid = (t0 + t) < seq_len
        h_new = jnp.where(valid, h_new, h)
        c_new = jnp.where(valid, c_new, c)
        # Unmasked (8, 128)-tile store into the lane-dense output chunk.
        out_ref[pl.ds(row, Bg), :] = h_new.astype(out_ref.dtype)
        return h_new, c_new

    h, c = lax.fori_loop(0, Tc, step, (h_sc[...], c_sc[...]),
                         unroll=min(8, Tc))
    h_sc[...] = h
    c_sc[...] = c

    # Final (h, c) for this batch group: write back on the last time chunk.
    @pl.when(ti == pl.num_programs(1) - 1)
    def _():
        hn_ref[...] = h.astype(hn_ref.dtype)
        cn_ref[...] = c.astype(cn_ref.dtype)


@functools.partial(jax.jit,
                   static_argnames=("compute_dtype", "time_chunk", "batch_block"))
def encoder_forward(x, w_ih, w_hh, b_ih, b_hh, *,
                    compute_dtype=jnp.float32, time_chunk=32, batch_block=8):
    """x: (B, T, D).  Returns (out (B,T,H), (h_n (1,B,H), c_n (1,B,H)))."""
    B, T, D = x.shape
    H = w_hh.shape[1]                      # PyTorch w_hh is (4H, H)
    Bg = batch_block                       # rows per batch group (sublane aligned)
    Bp = _round_up(max(B, Bg), Bg)
    nB = Bp // Bg
    Hp = _round_up(max(H, 128), 128)       # lane-aligned hidden size
    Tc = min(time_chunk, T)                # time steps per chunk
    Tp = _round_up(T, Tc)
    nT = Tp // Tc
    rows_chunk = Tc * Bg

    # Input slab: rows ordered (batch_group, time, row_within_group).
    xw = x.astype(compute_dtype)
    x_p = jnp.pad(xw, ((0, Bp - B), (0, Tp - T), (0, 0)))          # (Bp, Tp, D)
    x_slab = (x_p.reshape(nB, Bg, Tp, D)
                  .transpose(0, 2, 1, 3)
                  .reshape(nB * Tp * Bg, D))

    # Gate-blocked, lane-padded weights.  PyTorch gate order [i, f, g, o] is
    # reordered to [i, f, o, g] so the sigmoid gates are contiguous.  Zero
    # padding keeps the math exact: padded h/c lanes stay identically 0.
    order = [0, 1, 3, 2]
    wih_p = jnp.pad(w_ih.T.reshape(D, 4, H)[:, order, :],
                    ((0, 0), (0, 0), (0, Hp - H))
                    ).reshape(D, 4 * Hp).astype(compute_dtype)
    whh_p = jnp.pad(w_hh.T.reshape(H, 4, H)[:, order, :],
                    ((0, Hp - H), (0, 0), (0, Hp - H))
                    ).reshape(Hp, 4 * Hp).astype(compute_dtype)
    bias_p = jnp.pad((b_ih + b_hh).reshape(4, H)[order, :],
                     ((0, 0), (0, Hp - H))
                     ).reshape(1, 4 * Hp).astype(jnp.float32)

    # Explicit scoped-VMEM budget (blocks double-buffered + scratch), clamped
    # to stay under v7x's 64 MiB physical VMEM with headroom.
    dt = jnp.dtype(compute_dtype).itemsize
    est = (2 * (rows_chunk * D * dt               # x chunk
                + rows_chunk * Hp * 4             # out chunk
                + 2 * Bg * Hp * 4)                # hn / cn blocks
           + 2 * (D * 4 * Hp * dt + Hp * 4 * Hp * dt + 4 * Hp * 4)  # weights+bias
           + rows_chunk * 4 * Hp * 4              # gx scratch
           + 2 * Bg * Hp * 4)                     # h / c carry
    vmem_limit = int(min(max(2 * est, 32 * 2**20), 48 * 2**20))

    kernel = functools.partial(lstm_chunk_kernel, seq_len=T)

    out_slab, h_n, c_n = pl.pallas_call(
        kernel,
        out_shape=(
            jax.ShapeDtypeStruct((nB * Tp * Bg, Hp), jnp.float32),
            jax.ShapeDtypeStruct((Bp, Hp), jnp.float32),
            jax.ShapeDtypeStruct((Bp, Hp), jnp.float32),
        ),
        grid=(nB, nT),
        in_specs=[
            pl.BlockSpec((rows_chunk, D), lambda b, t: (b * nT + t, 0)),
            pl.BlockSpec((D, 4 * Hp), lambda b, t: (0, 0)),
            pl.BlockSpec((Hp, 4 * Hp), lambda b, t: (0, 0)),
            pl.BlockSpec((1, 4 * Hp), lambda b, t: (0, 0)),
        ],
        out_specs=(
            pl.BlockSpec((rows_chunk, Hp), lambda b, t: (b * nT + t, 0)),
            pl.BlockSpec((Bg, Hp), lambda b, t: (b, 0)),
            pl.BlockSpec((Bg, Hp), lambda b, t: (b, 0)),
        ),
        scratch_shapes=[
            pltpu.VMEM((rows_chunk, 4 * Hp), jnp.float32),   # hoisted x @ W_ih
            pltpu.VMEM((Bg, Hp), jnp.float32),               # h carry
            pltpu.VMEM((Bg, Hp), jnp.float32),               # c carry
        ],
        compiler_params=pltpu.CompilerParams(
            dimension_semantics=("parallel", "arbitrary"),
            vmem_limit_bytes=vmem_limit),
    )(x_slab, wih_p, whh_p, bias_p)

    # Un-pad / restore batch_first layout (pure layout plumbing in XLA).
    out = (out_slab.reshape(nB, Tp, Bg, Hp)
                   .transpose(0, 2, 1, 3)
                   .reshape(Bp, Tp, Hp)[:B, :T, :H])
    h_n = h_n[None, :B, :H]
    c_n = c_n[None, :B, :H]
    return out.astype(x.dtype), (h_n.astype(x.dtype), c_n.astype(x.dtype))


def encoder_reference(x, w_ih, w_hh, b_ih, b_hh):
    """Pure-JAX reference (lax.scan) matching torch.nn.LSTM, for validation."""
    B, T, D = x.shape
    H = w_hh.shape[1]
    bias = b_ih + b_hh

    def step(carry, x_t):
        h, c = carry
        gates = x_t @ w_ih.T + h @ w_hh.T + bias
        i = jax.nn.sigmoid(gates[:, 0 * H:1 * H])
        f = jax.nn.sigmoid(gates[:, 1 * H:2 * H])
        g = jnp.tanh(gates[:, 2 * H:3 * H])
        o = jax.nn.sigmoid(gates[:, 3 * H:4 * H])
        c_new = f * c + i * g
        h_new = o * jnp.tanh(c_new)
        return (h_new, c_new), h_new

    h0 = jnp.zeros((B, H), x.dtype)
    c0 = jnp.zeros((B, H), x.dtype)
    (h_n, c_n), out_tm = jax.lax.scan(step, (h0, c0), jnp.transpose(x, (1, 0, 2)))
    return jnp.transpose(out_tm, (1, 0, 2)), (h_n[None], c_n[None])


if __name__ == "__main__":
    # Shapes consistent with the module: Encoder(device=None, input_size=4,
    # hidden_size=32, num_layers=1);  x: (batch=2, seq=8, input_size=4)
    B, T, D, H = 2, 8, 4, 32

    key = jax.random.PRNGKey(0)
    kx, k1, k2, k3, k4 = jax.random.split(key, 5)

    # Deterministic parameter init, PyTorch-style U(-1/sqrt(H), 1/sqrt(H))
    bound = 1.0 / np.sqrt(H)
    w_ih = jax.random.uniform(k1, (4 * H, D), jnp.float32, -bound, bound)
    w_hh = jax.random.uniform(k2, (4 * H, H), jnp.float32, -bound, bound)
    b_ih = jax.random.uniform(k3, (4 * H,), jnp.float32, -bound, bound)
    b_hh = jax.random.uniform(k4, (4 * H,), jnp.float32, -bound, bound)

    x = jax.random.normal(kx, (B, T, D), jnp.float32)

    out_ref, (h_ref, c_ref) = encoder_reference(x, w_ih, w_hh, b_ih, b_hh)

    # 1) Default f32 path (single time chunk for this T).
    out, (h_n, c_n) = encoder_forward(x, w_ih, w_hh, b_ih, b_hh)
    jax.block_until_ready(out)
    jax.block_until_ready(h_n)
    jax.block_until_ready(c_n)
    assert out.shape == (B, T, H) and h_n.shape == (1, B, H) and c_n.shape == (1, B, H)
    np.testing.assert_allclose(np.asarray(out), np.asarray(out_ref), atol=1e-5, rtol=1e-5)
    np.testing.assert_allclose(np.asarray(h_n), np.asarray(h_ref), atol=1e-5, rtol=1e-5)
    np.testing.assert_allclose(np.asarray(c_n), np.asarray(c_ref), atol=1e-5, rtol=1e-5)

    # 2) Exercise the time-chunked grid + padded-step masking (T=8, Tc=3 -> 3 chunks).
    out_c, (h_c, c_c) = encoder_forward(x, w_ih, w_hh, b_ih, b_hh, time_chunk=3)
    jax.block_until_ready(out_c)
    np.testing.assert_allclose(np.asarray(out_c), np.asarray(out_ref), atol=1e-5, rtol=1e-5)
    np.testing.assert_allclose(np.asarray(h_c), np.asarray(h_ref), atol=1e-5, rtol=1e-5)
    np.testing.assert_allclose(np.asarray(c_c), np.asarray(c_ref), atol=1e-5, rtol=1e-5)

    # 3) bf16 weights/activations path (v6e/v7x MXU path), f32 gate math / state.
    out_b, (h_b, c_b) = encoder_forward(x, w_ih, w_hh, b_ih, b_hh,
                                        compute_dtype=jnp.bfloat16)
    jax.block_until_ready(out_b)
    np.testing.assert_allclose(np.asarray(out_b), np.asarray(out_ref), atol=5e-2, rtol=5e-2)
    np.testing.assert_allclose(np.asarray(h_b), np.asarray(h_ref), atol=5e-2, rtol=5e-2)
    np.testing.assert_allclose(np.asarray(c_b), np.asarray(c_ref), atol=5e-2, rtol=5e-2)

    print("KERNEL_OK")
</pallas_src>

<mosaic_0001>
module attributes {stable_mosaic.version = 11 : i64} {
  func.func @lstm_chunk_kernel(%arg0: i32, %arg1: i32, %arg2: memref<64x4xf32, #tpu.memory_space<vmem>>, %arg3: memref<4x512xf32, #tpu.memory_space<vmem>>, %arg4: memref<128x512xf32, #tpu.memory_space<vmem>>, %arg5: memref<1x512xf32, #tpu.memory_space<vmem>>, %arg6: memref<64x128xf32, #tpu.memory_space<vmem>>, %arg7: memref<8x128xf32, #tpu.memory_space<vmem>>, %arg8: memref<8x128xf32, #tpu.memory_space<vmem>>, %arg9: memref<64x512xf32, #tpu.memory_space<vmem>>, %arg10: memref<8x128xf32, #tpu.memory_space<vmem>>, %arg11: memref<8x128xf32, #tpu.memory_space<vmem>>) attributes {dimension_semantics = [#tpu.dimension_semantics<parallel>, #tpu.dimension_semantics<arbitrary>], iteration_bounds = array<i64: 1, 1>, scalar_prefetch = 0 : i64, scratch_operands = 3 : i64, tpu.core_type = #tpu.core_type<tc>, window_params = [{transform_indices = @transform_0, window_bounds = array<i64: 64, 4>}, {pipeline_mode = #tpu.pipeline_mode<synchronous>, transform_indices = @transform_1, window_bounds = array<i64: 4, 512>}, {pipeline_mode = #tpu.pipeline_mode<synchronous>, transform_indices = @transform_2, window_bounds = array<i64: 128, 512>}, {pipeline_mode = #tpu.pipeline_mode<synchronous>, transform_indices = @transform_3, window_bounds = array<i64: 1, 512>}, {transform_indices = @transform_4, window_bounds = array<i64: 64, 128>}, {transform_indices = @transform_5, window_bounds = array<i64: 8, 128>}, {transform_indices = @transform_6, window_bounds = array<i64: 8, 128>}]} {
    %c8_i32 = arith.constant 8 : i32
    %0 = arith.muli %arg1, %c8_i32 : i32
    %c0_i32 = arith.constant 0 : i32
    %1 = arith.cmpi eq, %arg1, %c0_i32 : i32
    %2 = arith.extui %1 : i1 to i32
    %c0_i32_0 = arith.constant 0 : i32
    %3 = arith.cmpi ne, %2, %c0_i32_0 : i32
    scf.if %3 {
      %cst_84 = arith.constant 0.000000e+00 : f32
      %250 = vector.broadcast %cst_84 : f32 to vector<8x128xf32>
      %c0_85 = arith.constant 0 : index
      %c0_86 = arith.constant 0 : index
      %251 = vector.load %arg10[%c0_85, %c0_86] : memref<8x128xf32, #tpu.memory_space<vmem>>, vector<8x128xf32>
      tpu.vector_store %arg10[%c0_85, %c0_86], %250 {strides = array<i32>} : memref<8x128xf32, #tpu.memory_space<vmem>>, vector<8x128xf32>,
      %cst_87 = arith.constant 0.000000e+00 : f32
      %252 = vector.broadcast %cst_87 : f32 to vector<8x128xf32>
      %c0_88 = arith.constant 0 : index
      %c0_89 = arith.constant 0 : index
      %253 = vector.load %arg11[%c0_88, %c0_89] : memref<8x128xf32, #tpu.memory_space<vmem>>, vector<8x128xf32>
      tpu.vector_store %arg11[%c0_88, %c0_89], %252 {strides = array<i32>} : memref<8x128xf32, #tpu.memory_space<vmem>>, vector<8x128xf32>,
    } else {
    }
    %c0 = arith.constant 0 : index
    %c0_1 = arith.constant 0 : index
    %4 = vector.load %arg2[%c0, %c0_1] : memref<64x4xf32, #tpu.memory_space<vmem>>, vector<64x4xf32>
    %c0_2 = arith.constant 0 : index
    %c0_3 = arith.constant 0 : index
    %5 = vector.load %arg3[%c0_2, %c0_3] : memref<4x512xf32, #tpu.memory_space<vmem>>, vector<4x512xf32>
    %cst = arith.constant dense<0.000000e+00> : vector<64x512xf32>
    %6 = tpu.matmul %4, %5, %cst {dimension_numbers = #tpu.dot_dimension_numbers<[1], [0], [0], [1], [0, 0, 1, 1], [], []>} : vector<64x4xf32>, vector<4x512xf32>, vector<64x512xf32> -> vector<64x512xf32>
    %c0_4 = arith.constant 0 : index
    %c0_5 = arith.constant 0 : index
    %7 = vector.load %arg5[%c0_4, %c0_5] : memref<1x512xf32, #tpu.memory_space<vmem>>, vector<1x512xf32>
    %8 = vector.broadcast %7 : vector<1x512xf32> to vector<64x512xf32>
    %9 = arith.addf %6, %8 : vector<64x512xf32>
    %c0_6 = arith.constant 0 : index
    %c0_7 = arith.constant 0 : index
    %10 = vector.load %arg9[%c0_6, %c0_7] : memref<64x512xf32, #tpu.memory_space<vmem>>, vector<64x512xf32>
    tpu.vector_store %arg9[%c0_6, %c0_7], %9 {strides = array<i32>} : memref<64x512xf32, #tpu.memory_space<vmem>>, vector<64x512xf32>,
    %c0_8 = arith.constant 0 : index
    %c0_9 = arith.constant 0 : index
    %11 = vector.load %arg10[%c0_8, %c0_9] : memref<8x128xf32, #tpu.memory_space<vmem>>, vector<8x128xf32>
    %c0_10 = arith.constant 0 : index
    %c0_11 = arith.constant 0 : index
    %12 = vector.load %arg11[%c0_10, %c0_11] : memref<8x128xf32, #tpu.memory_space<vmem>>, vector<8x128xf32>
    %c0_i32_12 = arith.constant 0 : i32
    %c8_i32_13 = arith.constant 8 : i32
    %13 = arith.muli %c0_i32_12, %c8_i32_13 : i32
    %14 = tpu.assume_multiple %13, 8 : i32
    %15 = arith.index_cast %14 : i32 to index
    %c0_14 = arith.constant 0 : index
    %16 = vector.load %arg9[%15, %c0_14] : memref<64x512xf32, #tpu.memory_space<vmem>>, vector<8x512xf32>
    %c0_15 = arith.constant 0 : index
    %c0_16 = arith.constant 0 : index
    %17 = vector.load %arg4[%c0_15, %c0_16] : memref<128x512xf32, #tpu.memory_space<vmem>>, vector<128x512xf32>
    %cst_17 = arith.constant dense<0.000000e+00> : vector<8x512xf32>
    %18 = tpu.matmul %11, %17, %cst_17 {dimension_numbers = #tpu.dot_dimension_numbers<[1], [0], [0], [1], [0, 0, 1, 1], [], []>} : vector<8x128xf32>, vector<128x512xf32>, vector<8x512xf32> -> vector<8x512xf32>
    %19 = arith.addf %16, %18 : vector<8x512xf32>
    %20 = vector.extract_strided_slice %19 {offsets = [0, 0], sizes = [8, 384], strides = [1, 1]} : vector<8x512xf32> to vector<8x384xf32>
    %21 = arith.negf %20 : vector<8x384xf32>
    %22 = math.exp %21 : vector<8x384xf32>
    %cst_18 = arith.constant 1.000000e+00 : f32
    %23 = vector.broadcast %cst_18 : f32 to vector<8x384xf32>
    %24 = arith.addf %23, %22 : vector<8x384xf32>
    %25 = arith.divf %23, %24 : vector<8x384xf32>
    %26 = vector.extract_strided_slice %25 {offsets = [0, 0], sizes = [8, 128], strides = [1, 1]} : vector<8x384xf32> to vector<8x128xf32>
    %27 = vector.extract_strided_slice %25 {offsets = [0, 128], sizes = [8, 128], strides = [1, 1]} : vector<8x384xf32> to vector<8x128xf32>
    %28 = vector.extract_strided_slice %25 {offsets = [0, 256], sizes = [8, 128], strides = [1, 1]} : vector<8x384xf32> to vector<8x128xf32>
    %29 = vector.extract_strided_slice %19 {offsets = [0, 384], sizes = [8, 128], strides = [1, 1]} : vector<8x512xf32> to vector<8x128xf32>
    %30 = math.tanh %29 : vector<8x128xf32>
    %31 = arith.mulf %27, %12 : vector<8x128xf32>
    %32 = arith.mulf %26, %30 : vector<8x128xf32>
    %33 = arith.addf %31, %32 : vector<8x128xf32>
    %34 = math.tanh %33 : vector<8x128xf32>
    %35 = arith.mulf %28, %34 : vector<8x128xf32>
    %36 = arith.addi %0, %c0_i32_12 : i32
    %c8_i32_19 = arith.constant 8 : i32
    %37 = arith.cmpi slt, %36, %c8_i32_19 : i32
    %38 = arith.select %37, %35, %11 : vector<8x128xf32>
    %39 = arith.select %37, %33, %12 : vector<8x128xf32>
    %40 = arith.index_cast %14 : i32 to index
    %c0_20 = arith.constant 0 : index
    %41 = vector.load %arg6[%40, %c0_20] : memref<64x128xf32, #tpu.memory_space<vmem>>, vector<8x128xf32>
    tpu.vector_store %arg6[%40, %c0_20], %38 {strides = array<i32>} : memref<64x128xf32, #tpu.memory_space<vmem>>, vector<8x128xf32>,
    %c1_i32 = arith.constant 1 : i32
    %c8_i32_21 = arith.constant 8 : i32
    %42 = arith.muli %c1_i32, %c8_i32_21 : i32
    %43 = tpu.assume_multiple %42, 8 : i32
    %44 = arith.index_cast %43 : i32 to index
    %c0_22 = arith.constant 0 : index
    %45 = vector.load %arg9[%44, %c0_22] : memref<64x512xf32, #tpu.memory_space<vmem>>, vector<8x512xf32>
    %c0_23 = arith.constant 0 : index
    %c0_24 = arith.constant 0 : index
    %46 = vector.load %arg4[%c0_23, %c0_24] : memref<128x512xf32, #tpu.memory_space<vmem>>, vector<128x512xf32>
    %cst_25 = arith.constant dense<0.000000e+00> : vector<8x512xf32>
    %47 = tpu.matmul %38, %46, %cst_25 {dimension_numbers = #tpu.dot_dimension_numbers<[1], [0], [0], [1], [0, 0, 1, 1], [], []>} : vector<8x128xf32>, vector<128x512xf32>, vector<8x512xf32> -> vector<8x512xf32>
    %48 = arith.addf %45, %47 : vector<8x512xf32>
    %49 = vector.extract_strided_slice %48 {offsets = [0, 0], sizes = [8, 384], strides = [1, 1]} : vector<8x512xf32> to vector<8x384xf32>
    %50 = arith.negf %49 : vector<8x384xf32>
    %51 = math.exp %50 : vector<8x384xf32>
    %cst_26 = arith.constant 1.000000e+00 : f32
    %52 = vector.broadcast %cst_26 : f32 to vector<8x384xf32>
    %53 = arith.addf %52, %51 : vector<8x384xf32>
    %54 = arith.divf %52, %53 : vector<8x384xf32>
    %55 = vector.extract_strided_slice %54 {offsets = [0, 0], sizes = [8, 128], strides = [1, 1]} : vector<8x384xf32> to vector<8x128xf32>
    %56 = vector.extract_strided_slice %54 {offsets = [0, 128], sizes = [8, 128], strides = [1, 1]} : vector<8x384xf32> to vector<8x128xf32>
    %57 = vector.extract_strided_slice %54 {offsets = [0, 256], sizes = [8, 128], strides = [1, 1]} : vector<8x384xf32> to vector<8x128xf32>
    %58 = vector.extract_strided_slice %48 {offsets = [0, 384], sizes = [8, 128], strides = [1, 1]} : vector<8x512xf32> to vector<8x128xf32>
    %59 = math.tanh %58 : vector<8x128xf32>
    %60 = arith.mulf %56, %39 : vector<8x128xf32>
    %61 = arith.mulf %55, %59 : vector<8x128xf32>
    %62 = arith.addf %60, %61 : vector<8x128xf32>
    %63 = math.tanh %62 : vector<8x128xf32>
    %64 = arith.mulf %57, %63 : vector<8x128xf32>
    %65 = arith.addi %0, %c1_i32 : i32
    %c8_i32_27 = arith.constant 8 : i32
    %66 = arith.cmpi slt, %65, %c8_i32_27 : i32
    %67 = arith.select %66, %64, %38 : vector<8x128xf32>
    %68 = arith.select %66, %62, %39 : vector<8x128xf32>
    %69 = arith.index_cast %43 : i32 to index
    %c0_28 = arith.constant 0 : index
    %70 = vector.load %arg6[%69, %c0_28] : memref<64x128xf32, #tpu.memory_space<vmem>>, vector<8x128xf32>
    tpu.vector_store %arg6[%69, %c0_28], %67 {strides = array<i32>} : memref<64x128xf32, #tpu.memory_space<vmem>>, vector<8x128xf32>,
    %c2_i32 = arith.constant 2 : i32
    %c8_i32_29 = arith.constant 8 : i32
    %71 = arith.muli %c2_i32, %c8_i32_29 : i32
    %72 = tpu.assume_multiple %71, 8 : i32
    %73 = arith.index_cast %72 : i32 to index
    %c0_30 = arith.constant 0 : index
    %74 = vector.load %arg9[%73, %c0_30] : memref<64x512xf32, #tpu.memory_space<vmem>>, vector<8x512xf32>
    %c0_31 = arith.constant 0 : index
    %c0_32 = arith.constant 0 : index
    %75 = vector.load %arg4[%c0_31, %c0_32] : memref<128x512xf32, #tpu.memory_space<vmem>>, vector<128x512xf32>
    %cst_33 = arith.constant dense<0.000000e+00> : vector<8x512xf32>
    %76 = tpu.matmul %67, %75, %cst_33 {dimension_numbers = #tpu.dot_dimension_numbers<[1], [0], [0], [1], [0, 0, 1, 1], [], []>} : vector<8x128xf32>, vector<128x512xf32>, vector<8x512xf32> -> vector<8x512xf32>
    %77 = arith.addf %74, %76 : vector<8x512xf32>
    %78 = vector.extract_strided_slice %77 {offsets = [0, 0], sizes = [8, 384], strides = [1, 1]} : vector<8x512xf32> to vector<8x384xf32>
    %79 = arith.negf %78 : vector<8x384xf32>
    %80 = math.exp %79 : vector<8x384xf32>
    %cst_34 = arith.constant 1.000000e+00 : f32
    %81 = vector.broadcast %cst_34 : f32 to vector<8x384xf32>
    %82 = arith.addf %81, %80 : vector<8x384xf32>
    %83 = arith.divf %81, %82 : vector<8x384xf32>
    %84 = vector.extract_strided_slice %83 {offsets = [0, 0], sizes = [8, 128], strides = [1, 1]} : vector<8x384xf32> to vector<8x128xf32>
    %85 = vector.extract_strided_slice %83 {offsets = [0, 128], sizes = [8, 128], strides = [1, 1]} : vector<8x384xf32> to vector<8x128xf32>
    %86 = vector.extract_strided_slice %83 {offsets = [0, 256], sizes = [8, 128], strides = [1, 1]} : vector<8x384xf32> to vector<8x128xf32>
    %87 = vector.extract_strided_slice %77 {offsets = [0, 384], sizes = [8, 128], strides = [1, 1]} : vector<8x512xf32> to vector<8x128xf32>
    %88 = math.tanh %87 : vector<8x128xf32>
    %89 = arith.mulf %85, %68 : vector<8x128xf32>
    %90 = arith.mulf %84, %88 : vector<8x128xf32>
    %91 = arith.addf %89, %90 : vector<8x128xf32>
    %92 = math.tanh %91 : vector<8x128xf32>
    %93 = arith.mulf %86, %92 : vector<8x128xf32>
    %94 = arith.addi %0, %c2_i32 : i32
    %c8_i32_35 = arith.constant 8 : i32
    %95 = arith.cmpi slt, %94, %c8_i32_35 : i32
    %96 = arith.select %95, %93, %67 : vector<8x128xf32>
    %97 = arith.select %95, %91, %68 : vector<8x128xf32>
    %98 = arith.index_cast %72 : i32 to index
    %c0_36 = arith.constant 0 : index
    %99 = vector.load %arg6[%98, %c0_36] : memref<64x128xf32, #tpu.memory_space<vmem>>, vector<8x128xf32>
    tpu.vector_store %arg6[%98, %c0_36], %96 {strides = array<i32>} : memref<64x128xf32, #tpu.memory_space<vmem>>, vector<8x128xf32>,
    %c3_i32 = arith.constant 3 : i32
    %c8_i32_37 = arith.constant 8 : i32
    %100 = arith.muli %c3_i32, %c8_i32_37 : i32
    %101 = tpu.assume_multiple %100, 8 : i32
    %102 = arith.index_cast %101 : i32 to index
    %c0_38 = arith.constant 0 : index
    %103 = vector.load %arg9[%102, %c0_38] : memref<64x512xf32, #tpu.memory_space<vmem>>, vector<8x512xf32>
    %c0_39 = arith.constant 0 : index
    %c0_40 = arith.constant 0 : index
    %104 = vector.load %arg4[%c0_39, %c0_40] : memref<128x512xf32, #tpu.memory_space<vmem>>, vector<128x512xf32>
    %cst_41 = arith.constant dense<0.000000e+00> : vector<8x512xf32>
    %105 = tpu.matmul %96, %104, %cst_41 {dimension_numbers = #tpu.dot_dimension_numbers<[1], [0], [0], [1], [0, 0, 1, 1], [], []>} : vector<8x128xf32>, vector<128x512xf32>, vector<8x512xf32> -> vector<8x512xf32>
    %106 = arith.addf %103, %105 : vector<8x512xf32>
    %107 = vector.extract_strided_slice %106 {offsets = [0, 0], sizes = [8, 384], strides = [1, 1]} : vector<8x512xf32> to vector<8x384xf32>
    %108 = arith.negf %107 : vector<8x384xf32>
    %109 = math.exp %108 : vector<8x384xf32>
    %cst_42 = arith.constant 1.000000e+00 : f32
    %110 = vector.broadcast %cst_42 : f32 to vector<8x384xf32>
    %111 = arith.addf %110, %109 : vector<8x384xf32>
    %112 = arith.divf %110, %111 : vector<8x384xf32>
    %113 = vector.extract_strided_slice %112 {offsets = [0, 0], sizes = [8, 128], strides = [1, 1]} : vector<8x384xf32> to vector<8x128xf32>
    %114 = vector.extract_strided_slice %112 {offsets = [0, 128], sizes = [8, 128], strides = [1, 1]} : vector<8x384xf32> to vector<8x128xf32>
    %115 = vector.extract_strided_slice %112 {offsets = [0, 256], sizes = [8, 128], strides = [1, 1]} : vector<8x384xf32> to vector<8x128xf32>
    %116 = vector.extract_strided_slice %106 {offsets = [0, 384], sizes = [8, 128], strides = [1, 1]} : vector<8x512xf32> to vector<8x128xf32>
    %117 = math.tanh %116 : vector<8x128xf32>
    %118 = arith.mulf %114, %97 : vector<8x128xf32>
    %119 = arith.mulf %113, %117 : vector<8x128xf32>
    %120 = arith.addf %118, %119 : vector<8x128xf32>
    %121 = math.tanh %120 : vector<8x128xf32>
    %122 = arith.mulf %115, %121 : vector<8x128xf32>
    %123 = arith.addi %0, %c3_i32 : i32
    %c8_i32_43 = arith.constant 8 : i32
    %124 = arith.cmpi slt, %123, %c8_i32_43 : i32
    %125 = arith.select %124, %122, %96 : vector<8x128xf32>
    %126 = arith.select %124, %120, %97 : vector<8x128xf32>
    %127 = arith.index_cast %101 : i32 to index
    %c0_44 = arith.constant 0 : index
    %128 = vector.load %arg6[%127, %c0_44] : memref<64x128xf32, #tpu.memory_space<vmem>>, vector<8x128xf32>
    tpu.vector_store %arg6[%127, %c0_44], %125 {strides = array<i32>} : memref<64x128xf32, #tpu.memory_space<vmem>>, vector<8x128xf32>,
    %c4_i32 = arith.constant 4 : i32
    %c8_i32_45 = arith.constant 8 : i32
    %129 = arith.muli %c4_i32, %c8_i32_45 : i32
    %130 = tpu.assume_multiple %129, 8 : i32
    %131 = arith.index_cast %130 : i32 to index
    %c0_46 = arith.constant 0 : index
    %132 = vector.load %arg9[%131, %c0_46] : memref<64x512xf32, #tpu.memory_space<vmem>>, vector<8x512xf32>
    %c0_47 = arith.constant 0 : index
    %c0_48 = arith.constant 0 : index
    %133 = vector.load %arg4[%c0_47, %c0_48] : memref<128x512xf32, #tpu.memory_space<vmem>>, vector<128x512xf32>
    %cst_49 = arith.constant dense<0.000000e+00> : vector<8x512xf32>
    %134 = tpu.matmul %125, %133, %cst_49 {dimension_numbers = #tpu.dot_dimension_numbers<[1], [0], [0], [1], [0, 0, 1, 1], [], []>} : vector<8x128xf32>, vector<128x512xf32>, vector<8x512xf32> -> vector<8x512xf32>
    %135 = arith.addf %132, %134 : vector<8x512xf32>
    %136 = vector.extract_strided_slice %135 {offsets = [0, 0], sizes = [8, 384], strides = [1, 1]} : vector<8x512xf32> to vector<8x384xf32>
    %137 = arith.negf %136 : vector<8x384xf32>
    %138 = math.exp %137 : vector<8x384xf32>
    %cst_50 = arith.constant 1.000000e+00 : f32
    %139 = vector.broadcast %cst_50 : f32 to vector<8x384xf32>
    %140 = arith.addf %139, %138 : vector<8x384xf32>
    %141 = arith.divf %139, %140 : vector<8x384xf32>
    %142 = vector.extract_strided_slice %141 {offsets = [0, 0], sizes = [8, 128], strides = [1, 1]} : vector<8x384xf32> to vector<8x128xf32>
    %143 = vector.extract_strided_slice %141 {offsets = [0, 128], sizes = [8, 128], strides = [1, 1]} : vector<8x384xf32> to vector<8x128xf32>
    %144 = vector.extract_strided_slice %141 {offsets = [0, 256], sizes = [8, 128], strides = [1, 1]} : vector<8x384xf32> to vector<8x128xf32>
    %145 = vector.extract_strided_slice %135 {offsets = [0, 384], sizes = [8, 128], strides = [1, 1]} : vector<8x512xf32> to vector<8x128xf32>
    %146 = math.tanh %145 : vector<8x128xf32>
    %147 = arith.mulf %143, %126 : vector<8x128xf32>
    %148 = arith.mulf %142, %146 : vector<8x128xf32>
    %149 = arith.addf %147, %148 : vector<8x128xf32>
    %150 = math.tanh %149 : vector<8x128xf32>
    %151 = arith.mulf %144, %150 : vector<8x128xf32>
    %152 = arith.addi %0, %c4_i32 : i32
    %c8_i32_51 = arith.constant 8 : i32
    %153 = arith.cmpi slt, %152, %c8_i32_51 : i32
    %154 = arith.select %153, %151, %125 : vector<8x128xf32>
    %155 = arith.select %153, %149, %126 : vector<8x128xf32>
    %156 = arith.index_cast %130 : i32 to index
    %c0_52 = arith.constant 0 : index
    %157 = vector.load %arg6[%156, %c0_52] : memref<64x128xf32, #tpu.memory_space<vmem>>, vector<8x128xf32>
    tpu.vector_store %arg6[%156, %c0_52], %154 {strides = array<i32>} : memref<64x128xf32, #tpu.memory_space<vmem>>, vector<8x128xf32>,
    %c5_i32 = arith.constant 5 : i32
    %c8_i32_53 = arith.constant 8 : i32
    %158 = arith.muli %c5_i32, %c8_i32_53 : i32
    %159 = tpu.assume_multiple %158, 8 : i32
    %160 = arith.index_cast %159 : i32 to index
    %c0_54 = arith.constant 0 : index
    %161 = vector.load %arg9[%160, %c0_54] : memref<64x512xf32, #tpu.memory_space<vmem>>, vector<8x512xf32>
    %c0_55 = arith.constant 0 : index
    %c0_56 = arith.constant 0 : index
    %162 = vector.load %arg4[%c0_55, %c0_56] : memref<128x512xf32, #tpu.memory_space<vmem>>, vector<128x512xf32>
    %cst_57 = arith.constant dense<0.000000e+00> : vector<8x512xf32>
    %163 = tpu.matmul %154, %162, %cst_57 {dimension_numbers = #tpu.dot_dimension_numbers<[1], [0], [0], [1], [0, 0, 1, 1], [], []>} : vector<8x128xf32>, vector<128x512xf32>, vector<8x512xf32> -> vector<8x512xf32>
    %164 = arith.addf %161, %163 : vector<8x512xf32>
    %165 = vector.extract_strided_slice %164 {offsets = [0, 0], sizes = [8, 384], strides = [1, 1]} : vector<8x512xf32> to vector<8x384xf32>
    %166 = arith.negf %165 : vector<8x384xf32>
    %167 = math.exp %166 : vector<8x384xf32>
    %cst_58 = arith.constant 1.000000e+00 : f32
    %168 = vector.broadcast %cst_58 : f32 to vector<8x384xf32>
    %169 = arith.addf %168, %167 : vector<8x384xf32>
    %170 = arith.divf %168, %169 : vector<8x384xf32>
    %171 = vector.extract_strided_slice %170 {offsets = [0, 0], sizes = [8, 128], strides = [1, 1]} : vector<8x384xf32> to vector<8x128xf32>
    %172 = vector.extract_strided_slice %170 {offsets = [0, 128], sizes = [8, 128], strides = [1, 1]} : vector<8x384xf32> to vector<8x128xf32>
    %173 = vector.extract_strided_slice %170 {offsets = [0, 256], sizes = [8, 128], strides = [1, 1]} : vector<8x384xf32> to vector<8x128xf32>
    %174 = vector.extract_strided_slice %164 {offsets = [0, 384], sizes = [8, 128], strides = [1, 1]} : vector<8x512xf32> to vector<8x128xf32>
    %175 = math.tanh %174 : vector<8x128xf32>
    %176 = arith.mulf %172, %155 : vector<8x128xf32>
    %177 = arith.mulf %171, %175 : vector<8x128xf32>
    %178 = arith.addf %176, %177 : vector<8x128xf32>
    %179 = math.tanh %178 : vector<8x128xf32>
    %180 = arith.mulf %173, %179 : vector<8x128xf32>
    %181 = arith.addi %0, %c5_i32 : i32
    %c8_i32_59 = arith.constant 8 : i32
    %182 = arith.cmpi slt, %181, %c8_i32_59 : i32
    %183 = arith.select %182, %180, %154 : vector<8x128xf32>
    %184 = arith.select %182, %178, %155 : vector<8x128xf32>
    %185 = arith.index_cast %159 : i32 to index
    %c0_60 = arith.constant 0 : index
    %186 = vector.load %arg6[%185, %c0_60] : memref<64x128xf32, #tpu.memory_space<vmem>>, vector<8x128xf32>
    tpu.vector_store %arg6[%185, %c0_60], %183 {strides = array<i32>} : memref<64x128xf32, #tpu.memory_space<vmem>>, vector<8x128xf32>,
    %c6_i32 = arith.constant 6 : i32
    %c8_i32_61 = arith.constant 8 : i32
    %187 = arith.muli %c6_i32, %c8_i32_61 : i32
    %188 = tpu.assume_multiple %187, 8 : i32
    %189 = arith.index_cast %188 : i32 to index
    %c0_62 = arith.constant 0 : index
    %190 = vector.load %arg9[%189, %c0_62] : memref<64x512xf32, #tpu.memory_space<vmem>>, vector<8x512xf32>
    %c0_63 = arith.constant 0 : index
    %c0_64 = arith.constant 0 : index
    %191 = vector.load %arg4[%c0_63, %c0_64] : memref<128x512xf32, #tpu.memory_space<vmem>>, vector<128x512xf32>
    %cst_65 = arith.constant dense<0.000000e+00> : vector<8x512xf32>
    %192 = tpu.matmul %183, %191, %cst_65 {dimension_numbers = #tpu.dot_dimension_numbers<[1], [0], [0], [1], [0, 0, 1, 1], [], []>} : vector<8x128xf32>, vector<128x512xf32>, vector<8x512xf32> -> vector<8x512xf32>
    %193 = arith.addf %190, %192 : vector<8x512xf32>
    %194 = vector.extract_strided_slice %193 {offsets = [0, 0], sizes = [8, 384], strides = [1, 1]} : vector<8x512xf32> to vector<8x384xf32>
    %195 = arith.negf %194 : vector<8x384xf32>
    %196 = math.exp %195 : vector<8x384xf32>
    %cst_66 = arith.constant 1.000000e+00 : f32
    %197 = vector.broadcast %cst_66 : f32 to vector<8x384xf32>
    %198 = arith.addf %197, %196 : vector<8x384xf32>
    %199 = arith.divf %197, %198 : vector<8x384xf32>
    %200 = vector.extract_strided_slice %199 {offsets = [0, 0], sizes = [8, 128], strides = [1, 1]} : vector<8x384xf32> to vector<8x128xf32>
    %201 = vector.extract_strided_slice %199 {offsets = [0, 128], sizes = [8, 128], strides = [1, 1]} : vector<8x384xf32> to vector<8x128xf32>
    %202 = vector.extract_strided_slice %199 {offsets = [0, 256], sizes = [8, 128], strides = [1, 1]} : vector<8x384xf32> to vector<8x128xf32>
    %203 = vector.extract_strided_slice %193 {offsets = [0, 384], sizes = [8, 128], strides = [1, 1]} : vector<8x512xf32> to vector<8x128xf32>
    %204 = math.tanh %203 : vector<8x128xf32>
    %205 = arith.mulf %201, %184 : vector<8x128xf32>
    %206 = arith.mulf %200, %204 : vector<8x128xf32>
    %207 = arith.addf %205, %206 : vector<8x128xf32>
    %208 = math.tanh %207 : vector<8x128xf32>
    %209 = arith.mulf %202, %208 : vector<8x128xf32>
    %210 = arith.addi %0, %c6_i32 : i32
    %c8_i32_67 = arith.constant 8 : i32
    %211 = arith.cmpi slt, %210, %c8_i32_67 : i32
    %212 = arith.select %211, %209, %183 : vector<8x128xf32>
    %213 = arith.select %211, %207, %184 : vector<8x128xf32>
    %214 = arith.index_cast %188 : i32 to index
    %c0_68 = arith.constant 0 : index
    %215 = vector.load %arg6[%214, %c0_68] : memref<64x128xf32, #tpu.memory_space<vmem>>, vector<8x128xf32>
    tpu.vector_store %arg6[%214, %c0_68], %212 {strides = array<i32>} : memref<64x128xf32, #tpu.memory_space<vmem>>, vector<8x128xf32>,
    %c7_i32 = arith.constant 7 : i32
    %c8_i32_69 = arith.constant 8 : i32
    %216 = arith.muli %c7_i32, %c8_i32_69 : i32
    %217 = tpu.assume_multiple %216, 8 : i32
    %218 = arith.index_cast %217 : i32 to index
    %c0_70 = arith.constant 0 : index
    %219 = vector.load %arg9[%218, %c0_70] : memref<64x512xf32, #tpu.memory_space<vmem>>, vector<8x512xf32>
    %c0_71 = arith.constant 0 : index
    %c0_72 = arith.constant 0 : index
    %220 = vector.load %arg4[%c0_71, %c0_72] : memref<128x512xf32, #tpu.memory_space<vmem>>, vector<128x512xf32>
    %cst_73 = arith.constant dense<0.000000e+00> : vector<8x512xf32>
    %221 = tpu.matmul %212, %220, %cst_73 {dimension_numbers = #tpu.dot_dimension_numbers<[1], [0], [0], [1], [0, 0, 1, 1], [], []>} : vector<8x128xf32>, vector<128x512xf32>, vector<8x512xf32> -> vector<8x512xf32>
    %222 = arith.addf %219, %221 : vector<8x512xf32>
    %223 = vector.extract_strided_slice %222 {offsets = [0, 0], sizes = [8, 384], strides = [1, 1]} : vector<8x512xf32> to vector<8x384xf32>
    %224 = arith.negf %223 : vector<8x384xf32>
    %225 = math.exp %224 : vector<8x384xf32>
    %cst_74 = arith.constant 1.000000e+00 : f32
    %226 = vector.broadcast %cst_74 : f32 to vector<8x384xf32>
    %227 = arith.addf %226, %225 : vector<8x384xf32>
    %228 = arith.divf %226, %227 : vector<8x384xf32>
    %229 = vector.extract_strided_slice %228 {offsets = [0, 0], sizes = [8, 128], strides = [1, 1]} : vector<8x384xf32> to vector<8x128xf32>
    %230 = vector.extract_strided_slice %228 {offsets = [0, 128], sizes = [8, 128], strides = [1, 1]} : vector<8x384xf32> to vector<8x128xf32>
    %231 = vector.extract_strided_slice %228 {offsets = [0, 256], sizes = [8, 128], strides = [1, 1]} : vector<8x384xf32> to vector<8x128xf32>
    %232 = vector.extract_strided_slice %222 {offsets = [0, 384], sizes = [8, 128], strides = [1, 1]} : vector<8x512xf32> to vector<8x128xf32>
    %233 = math.tanh %232 : vector<8x128xf32>
    %234 = arith.mulf %230, %213 : vector<8x128xf32>
    %235 = arith.mulf %229, %233 : vector<8x128xf32>
    %236 = arith.addf %234, %235 : vector<8x128xf32>
    %237 = math.tanh %236 : vector<8x128xf32>
    %238 = arith.mulf %231, %237 : vector<8x128xf32>
    %239 = arith.addi %0, %c7_i32 : i32
    %c8_i32_75 = arith.constant 8 : i32
    %240 = arith.cmpi slt, %239, %c8_i32_75 : i32
    %241 = arith.select %240, %238, %212 : vector<8x128xf32>
    %242 = arith.select %240, %236, %213 : vector<8x128xf32>
    %243 = arith.index_cast %217 : i32 to index
    %c0_76 = arith.constant 0 : index
    %244 = vector.load %arg6[%243, %c0_76] : memref<64x128xf32, #tpu.memory_space<vmem>>, vector<8x128xf32>
    tpu.vector_store %arg6[%243, %c0_76], %241 {strides = array<i32>} : memref<64x128xf32, #tpu.memory_space<vmem>>, vector<8x128xf32>,
    %c8_i32_77 = arith.constant 8 : i32
    %c0_78 = arith.constant 0 : index
    %c0_79 = arith.constant 0 : index
    %245 = vector.load %arg10[%c0_78, %c0_79] : memref<8x128xf32, #tpu.memory_space<vmem>>, vector<8x128xf32>
    tpu.vector_store %arg10[%c0_78, %c0_79], %241 {strides = array<i32>} : memref<8x128xf32, #tpu.memory_space<vmem>>, vector<8x128xf32>,
    %c0_80 = arith.constant 0 : index
    %c0_81 = arith.constant 0 : index
    %246 = vector.load %arg11[%c0_80, %c0_81] : memref<8x128xf32, #tpu.memory_space<vmem>>, vector<8x128xf32>
    tpu.vector_store %arg11[%c0_80, %c0_81], %242 {strides = array<i32>} : memref<8x128xf32, #tpu.memory_space<vmem>>, vector<8x128xf32>,
    %c0_i32_82 = arith.constant 0 : i32
    %247 = arith.cmpi eq, %arg1, %c0_i32_82 : i32
    %248 = arith.extui %247 : i1 to i32
    %c0_i32_83 = arith.constant 0 : i32
    %249 = arith.cmpi ne, %248, %c0_i32_83 : i32
    scf.if %249 {
      %c0_84 = arith.constant 0 : index
      %c0_85 = arith.constant 0 : index
      %250 = vector.load %arg7[%c0_84, %c0_85] : memref<8x128xf32, #tpu.memory_space<vmem>>, vector<8x128xf32>
      tpu.vector_store %arg7[%c0_84, %c0_85], %241 {strides = array<i32>} : memref<8x128xf32, #tpu.memory_space<vmem>>, vector<8x128xf32>,
      %c0_86 = arith.constant 0 : index
      %c0_87 = arith.constant 0 : index
      %251 = vector.load %arg8[%c0_86, %c0_87] : memref<8x128xf32, #tpu.memory_space<vmem>>, vector<8x128xf32>
      tpu.vector_store %arg8[%c0_86, %c0_87], %242 {strides = array<i32>} : memref<8x128xf32, #tpu.memory_space<vmem>>, vector<8x128xf32>,
    } else {
    }
    return
  }
  func.func @transform_0(%arg0: i32, %arg1: i32) -> (i32, i32) {
    %c1_i32 = arith.constant 1 : i32
    %0 = arith.muli %arg0, %c1_i32 : i32
    %1 = arith.addi %0, %arg1 : i32
    %c0_i32 = arith.constant 0 : i32
    %c0_i32_0 = arith.constant 0 : i32
    return %1, %c0_i32 : i32, i32
  }
  func.func @transform_1(%arg0: i32, %arg1: i32) -> (i32, i32) {
    %c0_i32 = arith.constant 0 : i32
    %c0_i32_0 = arith.constant 0 : i32
    %c0_i32_1 = arith.constant 0 : i32
    return %c0_i32, %c0_i32_0 : i32, i32
  }
  func.func @transform_2(%arg0: i32, %arg1: i32) -> (i32, i32) {
    %c0_i32 = arith.constant 0 : i32
    %c0_i32_0 = arith.constant 0 : i32
    %c0_i32_1 = arith.constant 0 : i32
    return %c0_i32, %c0_i32_0 : i32, i32
  }
  func.func @transform_3(%arg0: i32, %arg1: i32) -> (i32, i32) {
    %c0_i32 = arith.constant 0 : i32
    %c0_i32_0 = arith.constant 0 : i32
    %c0_i32_1 = arith.constant 0 : i32
    return %c0_i32, %c0_i32_0 : i32, i32
  }
  func.func @transform_4(%arg0: i32, %arg1: i32) -> (i32, i32) {
    %c1_i32 = arith.constant 1 : i32
    %0 = arith.muli %arg0, %c1_i32 : i32
    %1 = arith.addi %0, %arg1 : i32
    %c0_i32 = arith.constant 0 : i32
    %c0_i32_0 = arith.constant 0 : i32
    return %1, %c0_i32 : i32, i32
  }
  func.func @transform_5(%arg0: i32, %arg1: i32) -> (i32, i32) {
    %c0_i32 = arith.constant 0 : i32
    %c0_i32_0 = arith.constant 0 : i32
    return %arg0, %c0_i32 : i32, i32
  }
  func.func @transform_6(%arg0: i32, %arg1: i32) -> (i32, i32) {
    %c0_i32 = arith.constant 0 : i32
    %c0_i32_0 = arith.constant 0 : i32
    return %arg0, %c0_i32 : i32, i32
  }
}

</mosaic_0001>

<bundles_post_ra>
// kernel: encoder_forward.1
= control target key start
LH: loop header
LB: loop body
LE: loop exit
PB: predicated region body
PF: predicated region fallthrough
CT: control target
= control target key end

     0   :  { %vm124_vm0 = vcmask 1043456   ;;  %v3203_v2 = vmov 0.0   ;;  %vm99_vm1 = vcmask 31744   ;;  %s4248_s1 = inlined_call_operand.vmem [shape: f32[4,512], index: 1, kind: input, shape index: {}]   ;;  %s4249_s0 = inlined_call_operand.vmem [shape: f32[64,4], index: 0, kind: input, shape index: {}]   ;;  %s4250_s2 = inlined_call_operand.vmem [shape: f32[128,512], index: 2, kind: input, shape index: {}]   ;;  %s4251_s3 = inlined_call_operand.vmem [shape: f32[1,512], index: 3, kind: input, shape index: {}]   ;;  %s4252_s4 = inlined_call_operand.vmem [shape: f32[64,128], index: 4, kind: output, shape index: {0}]   ;;  %s4253_s6 = inlined_call_operand.vmem [shape: f32[8,128], index: 6, kind: output, shape index: {2}]   ;;  %s4254_s5 = inlined_call_operand.vmem [shape: f32[8,128], index: 5, kind: output, shape index: {1}]  }
   0x1   :  { %v71_v0 = vld [vmem:[%s4248_s1] sm:$0xff]  ;;  %v72_v1 = vld [vmem:[%s4248_s1 + $0x8] sm:$0xff]  ;;  %197 = vmatprep.mubr.f32.mxu0 %v3203_v2  ;;  %310 = vmatprep.mubr.f32.mxu1 %v3203_v2  ;;  %v403_v8 = vld [vmem:[%s4250_s2 + $0x18] sm:$0xff] }
   0x2   :  { %v63_v3 = vld [vmem:[%s4249_s0] sm:$0xff]  ;;  %v97_v4 = vcombine.high %v71_v0, %v71_v0  ;;  %v98_v5 = vcombine.high %v72_v1, %v72_v1  ;;  %v401_v6 = vld [vmem:[%s4250_s2 + $0x8] sm:$0xff]  ;;  %v407_v10 = vld [vmem:[%s4250_s2 + $0x38] sm:$0xff] }
   0x3   :  { %v405_v7 = vld [vmem:[%s4250_s2 + $0x28] sm:$0xff]  ;;  %v400_v11 = vld [vmem:[%s4250_s2] sm:$0xff]  ;;  %v3272_v13 = vpack.c.bf16 %v407_v10, %v403_v8  ;;  %v402_v15 = vld [vmem:[%s4250_s2 + $0x10] sm:$0xff] }
   0x4   :  { %v3259_v9 = vpack.c.bf16 %v405_v7, %v401_v6  ;;  %v404_v12 = vld [vmem:[%s4250_s2 + $0x20] sm:$0xff]  ;;  %2445 = vmatprep.subr.msk.mxu0 %vm124_vm0, %v97_v4  ;;  %2455 = vmatprep.subr.msk.mxu1 %vm124_vm0, %v98_v5  ;;  %v406_v16 = vld [vmem:[%s4250_s2 + $0x30] sm:$0xff]  ;;  %v409_v18 = vld [vmem:[%s4250_s2 + $0x48] sm:$0xff] }
   0x5   :  { %v3274_v14 = vpack.c.bf16 %v404_v12, %v400_v11  ;;  %2446 = vmatpush1.msk.msra.mxu0 %vm124_vm0, %v71_v0  ;;  %2456 = vmatpush1.msk.msra.mxu1 %vm124_vm0, %v72_v1  ;;  %v3284_v17 = vpack.c.bf16 %v406_v16, %v402_v15  ;;  %v413_v19 = vld [vmem:[%s4250_s2 + $0x68] sm:$0xff]  ;;  %v411_v20 = vld [vmem:[%s4250_s2 + $0x58] sm:$0xff]  ;;  %v408_v22 = vld [vmem:[%s4250_s2 + $0x40] sm:$0xff] }
   0x6   :  { %2447 = vmatmul.mubr.msk.f32.vlgmr.msra.gmra.mrb[0].mxu0 %vm99_vm1, %v63_v3  ;;  %2457 = vmatmul.mubr.msk.f32.vlgmr.msra.gmra.mrb[0].mxu1 %vm99_vm1, %v63_v3  ;;  %v415_v21 = vld [vmem:[%s4250_s2 + $0x78] sm:$0xff]  ;;  %v412_v23 = vld [vmem:[%s4250_s2 + $0x60] sm:$0xff]  ;;  %v64_v24 = vld [vmem:[%s4249_s0 + $0x8] sm:$0xff]  ;;  %v3311_v25 = vpack.c.bf16 %v413_v19, %v409_v18 }
   0x7   :  { %2497 = vmatprep.subr.bf16.mxu0 %v3259_v9  ;;  %2529 = vmatprep.subr.bf16.mxu1 %v3272_v13  ;;  %v3313_v26 = vpack.c.bf16 %v415_v21, %v411_v20  ;;  %v410_v27 = vld [vmem:[%s4250_s2 + $0x50] sm:$0xff]  ;;  %v3323_v29 = vpack.c.bf16 %v412_v23, %v408_v22  ;;  %v417_v31 = vld [vmem:[%s4250_s2 + $0x88] sm:$0xff]  ;;  %v419_v33 = vld [vmem:[%s4250_s2 + $0x98] sm:$0xff] }
   0x8   :  { %v414_v28 = vld [vmem:[%s4250_s2 + $0x70] sm:$0xff]  ;;  %2499 = vmatpush1.bf16.msra.mxu0 %v3274_v14  ;;  %2531 = vmatpush1.bf16.msra.mxu1 %v3284_v17  ;;  %v421_v32 = vld [vmem:[%s4250_s2 + $0xa8] sm:$0xff]  ;;  %v423_v34 = vld [vmem:[%s4250_s2 + $0xb8] sm:$0xff] }
   0x9   :  { %v3325_v30 = vpack.c.bf16 %v414_v28, %v410_v27  ;;  %203 = vmatprep.mubr.f32.mxu0 %v3203_v2  ;;  %316 = vmatprep.mubr.f32.mxu1 %v3203_v2  ;;  %v416_v35 = vld [vmem:[%s4250_s2 + $0x80] sm:$0xff]  ;;  %v418_v37 = vld [vmem:[%s4250_s2 + $0x90] sm:$0xff]  ;;  %v3360_v40 = vpack.c.bf16 %v421_v32, %v417_v31  ;;  %v3362_v41 = vpack.c.bf16 %v423_v34, %v419_v33  ;;  %v425_v42 = vld [vmem:[%s4250_s2 + $0xc8] sm:$0xff] }
   0xa   :  { %v420_v36 = vld [vmem:[%s4250_s2 + $0xa0] sm:$0xff]  ;;  %2448 = vmatmul.mubr.msk.f32.gmra.mrb[2].mxu0 %vm99_vm1, %v64_v24  ;;  %2458 = vmatmul.mubr.msk.f32.gmra.mrb[2].mxu1 %vm99_vm1, %v64_v24  ;;  %v422_v38 = vld [vmem:[%s4250_s2 + $0xb0] sm:$0xff]  ;;  %v429_v43 = vld [vmem:[%s4250_s2 + $0xe8] sm:$0xff] }
   0xb   :  { %2501 = vmatprep.subr.bf16.mxu0 %v3311_v25  ;;  %2533 = vmatprep.subr.bf16.mxu1 %v3313_v26  ;;  %v65_v39 = vld [vmem:[%s4249_s0 + $0x10] sm:$0xff]  ;;  %v3372_v44 = vpack.c.bf16 %v420_v36, %v416_v35  ;;  %v3374_v45 = vpack.c.bf16 %v422_v38, %v418_v37  ;;  %v427_v46 = vld [vmem:[%s4250_s2 + $0xd8] sm:$0xff]  ;;  %v424_v48 = vld [vmem:[%s4250_s2 + $0xc0] sm:$0xff]  ;;  %v3403_v53 = vpack.c.bf16 %v429_v43, %v425_v42 }
   0xc   :  { %2503 = vmatpush1.bf16.msra.mxu0 %v3323_v29  ;;  %2535 = vmatpush1.bf16.msra.mxu1 %v3325_v30  ;;  %v431_v47 = vld [vmem:[%s4250_s2 + $0xf8] sm:$0xff]  ;;  %v428_v49 = vld [vmem:[%s4250_s2 + $0xe0] sm:$0xff]  ;;  %v426_v50 = vld [vmem:[%s4250_s2 + $0xd0] sm:$0xff] }
   0xd   :  { %209 = vmatprep.mubr.f32.mxu0 %v3203_v2  ;;  %322 = vmatprep.mubr.f32.mxu1 %v3203_v2  ;;  %v430_v51 = vld [vmem:[%s4250_s2 + $0xf0] sm:$0xff]  ;;  %v66_v52 = vld [vmem:[%s4249_s0 + $0x18] sm:$0xff]  ;;  %v3405_v54 = vpack.c.bf16 %v431_v47, %v427_v46  ;;  %v433_v55 = vld [vmem:[%s4250_s2 + $0x108] sm:$0xff]  ;;  %v3415_v57 = vpack.c.bf16 %v428_v49, %v424_v48 }
   0xe   :  { %2449 = vmatmul.mubr.msk.f32.gmra.mrb[4].mxu0 %vm99_vm1, %v65_v39  ;;  %2459 = vmatmul.mubr.msk.f32.gmra.mrb[4].mxu1 %vm99_vm1, %v65_v39  ;;  %v437_v56 = vld [vmem:[%s4250_s2 + $0x128] sm:$0xff]  ;;  %v3417_v58 = vpack.c.bf16 %v430_v51, %v426_v50  ;;  %v435_v59 = vld [vmem:[%s4250_s2 + $0x118] sm:$0xff]  ;;  %v432_v61 = vld [vmem:[%s4250_s2 + $0x100] sm:$0xff] }
   0xf   :  { %2505 = vmatprep.subr.bf16.mxu0 %v3360_v40  ;;  %2537 = vmatprep.subr.bf16.mxu1 %v3362_v41  ;;  %v439_v60 = vld [vmem:[%s4250_s2 + $0x138] sm:$0xff]  ;;  %v436_v62 = vld [vmem:[%s4250_s2 + $0x120] sm:$0xff]  ;;  %v434_v63 = vld [vmem:[%s4250_s2 + $0x110] sm:$0xff]  ;;  %v3446_v3 = vpack.c.bf16 %v437_v56, %v433_v55 }
  0x10   :  { %2507 = vmatpush1.bf16.msra.mxu0 %v3372_v44  ;;  %2539 = vmatpush1.bf16.msra.mxu1 %v3374_v45  ;;  %v438_v0 = vld [vmem:[%s4250_s2 + $0x130] sm:$0xff]  ;;  %v67_v1 = vld [vmem:[%s4249_s0 + $0x20] sm:$0xff]  ;;  %v3448_v4 = vpack.c.bf16 %v439_v60, %v435_v59  ;;  %v441_v5 = vld [vmem:[%s4250_s2 + $0x148] sm:$0xff]  ;;  %v3458_v7 = vpack.c.bf16 %v436_v62, %v432_v61  ;;  %v75_v62 = vlaneseq }
  0x11   :  { %215 = vmatprep.mubr.f32.mxu0 %v3203_v2  ;;  %328 = vmatprep.mubr.f32.mxu1 %v3203_v2  ;;  %v445_v6 = vld [vmem:[%s4250_s2 + $0x168] sm:$0xff]  ;;  %v3460_v8 = vpack.c.bf16 %v438_v0, %v434_v63  ;;  %v443_v10 = vld [vmem:[%s4250_s2 + $0x158] sm:$0xff]  ;;  %v440_v12 = vld [vmem:[%s4250_s2 + $0x140] sm:$0xff] }
  0x12   :  { %2450 = vmatmul.mubr.msk.f32.gmra.mrb[6].mxu0 %vm99_vm1, %v66_v52  ;;  %2460 = vmatmul.mubr.msk.f32.gmra.mrb[6].mxu1 %vm99_vm1, %v66_v52  ;;  %v447_v11 = vld [vmem:[%s4250_s2 + $0x178] sm:$0xff]  ;;  %v444_v15 = vld [vmem:[%s4250_s2 + $0x160] sm:$0xff]  ;;  %v442_v16 = vld [vmem:[%s4250_s2 + $0x150] sm:$0xff]  ;;  %v3489_v20 = vpack.c.bf16 %v445_v6, %v441_v5  ;;  %v76_v63 = vshrl.u32 %v75_v62, 7 }
  0x13   :  { %2509 = vmatprep.subr.bf16.mxu0 %v3403_v53  ;;  %2541 = vmatprep.subr.bf16.mxu1 %v3405_v54  ;;  %v446_v18 = vld [vmem:[%s4250_s2 + $0x170] sm:$0xff]  ;;  %v68_v19 = vld [vmem:[%s4249_s0 + $0x28] sm:$0xff]  ;;  %v3491_v21 = vpack.c.bf16 %v447_v11, %v443_v10  ;;  %v3501_v24 = vpack.c.bf16 %v444_v15, %v440_v12  ;;  %v451_v28 = vld [vmem:[%s4250_s2 + $0x198] sm:$0xff] }
  0x14   :  { %2511 = vmatpush1.bf16.msra.mxu0 %v3415_v57  ;;  %2543 = vmatpush1.bf16.msra.mxu1 %v3417_v58  ;;  %v449_v22 = vld [vmem:[%s4250_s2 + $0x188] sm:$0xff]  ;;  %v3503_v27 = vpack.c.bf16 %v446_v18, %v442_v16  ;;  %v455_v31 = vld [vmem:[%s4250_s2 + $0x1b8] sm:$0xff]  ;;  %v448_v32 = vld [vmem:[%s4250_s2 + $0x180] sm:$0xff]  ;;  %v77_v0 = vsub.s32 0, %v76_v63  ;;  %v81_v5 = vsub.s32 1, %v76_v63  ;;  %v85_v16 = vsub.s32 2, %v76_v63 }
  0x15   :  { %221 = vmatprep.mubr.f32.mxu0 %v3203_v2  ;;  %334 = vmatprep.mubr.f32.mxu1 %v3203_v2  ;;  %v453_v23 = vld [vmem:[%s4250_s2 + $0x1a8] sm:$0xff]  ;;  %v452_v33 = vld [vmem:[%s4250_s2 + $0x1a0] sm:$0xff]  ;;  %v450_v34 = vld [vmem:[%s4250_s2 + $0x190] sm:$0xff]  ;;  %v3534_v38 = vpack.c.bf16 %v455_v31, %v451_v28 }
  0x16   :  { %2451 = vmatmul.mubr.msk.f32.gmra.mrb[8].mxu0 %vm99_vm1, %v67_v1  ;;  %2461 = vmatmul.mubr.msk.f32.gmra.mrb[8].mxu1 %vm99_vm1, %v67_v1  ;;  %v454_v35 = vld [vmem:[%s4250_s2 + $0x1b0] sm:$0xff]  ;;  %v3532_v37 = vpack.c.bf16 %v453_v23, %v449_v22  ;;  %v457_v39 = vld [vmem:[%s4250_s2 + $0x1c8] sm:$0xff]  ;;  %v3544_v43 = vpack.c.bf16 %v452_v33, %v448_v32  ;;  %v459_v47 = vld [vmem:[%s4250_s2 + $0x1d8] sm:$0xff]  ;;  %v89_v23 = vsub.s32 3, %v76_v63 }
  0x17   :  { %2513 = vmatprep.subr.bf16.mxu0 %v3446_v3  ;;  %2545 = vmatprep.subr.bf16.mxu1 %v3448_v4  ;;  %v69_v36 = vld [vmem:[%s4249_s0 + $0x30] sm:$0xff]  ;;  %v461_v42 = vld [vmem:[%s4250_s2 + $0x1e8] sm:$0xff]  ;;  %v3546_v46 = vpack.c.bf16 %v454_v35, %v450_v34  ;;  %v463_v48 = vld [vmem:[%s4250_s2 + $0x1f8] sm:$0xff] }
  0x18   :  { %2515 = vmatpush1.bf16.msra.mxu0 %v3458_v7  ;;  %2547 = vmatpush1.bf16.msra.mxu1 %v3460_v8  ;;  %v456_v49 = vld [vmem:[%s4250_s2 + $0x1c0] sm:$0xff]  ;;  %v458_v51 = vld [vmem:[%s4250_s2 + $0x1d0] sm:$0xff]  ;;  %v70_v55 = vld [vmem:[%s4249_s0 + $0x38] sm:$0xff]  ;;  %v3575_v56 = vpack.c.bf16 %v461_v42, %v457_v39  ;;  %v3577_v59 = vpack.c.bf16 %v463_v48, %v459_v47 }
  0x19   :  { %227 = vmatprep.mubr.f32.mxu0 %v3203_v2  ;;  %340 = vmatprep.mubr.f32.mxu1 %v3203_v2  ;;  %v460_v50 = vld [vmem:[%s4250_s2 + $0x1e0] sm:$0xff]  ;;  %v462_v52 = vld [vmem:[%s4250_s2 + $0x1f0] sm:$0xff] }
  0x1a   :  { %2452 = vmatmul.mubr.msk.f32.gmra.mrb[10].mxu0 %vm99_vm1, %v68_v19  ;;  %2462 = vmatmul.mubr.msk.f32.gmra.mrb[10].mxu1 %vm99_vm1, %v68_v19  ;;  %v3581_v60 = vpack.c.bf16 %v460_v50, %v456_v49  ;;  %v3583_v61 = vpack.c.bf16 %v462_v52, %v458_v51  ;;  %v73_v1 = vld [vmem:[%s4251_s3] sm:$0xf] }
  0x1b   :  { %2517 = vmatprep.subr.bf16.mxu0 %v3489_v20  ;;  %2549 = vmatprep.subr.bf16.mxu1 %v3491_v21  ;;  %v3636_v6 = vrot.slane %v73_v1, %v77_v0  ;;  %v3638_v10 = vrot.slane %v73_v1, %v81_v5  ;;  %v3642_v28 = vrot.slane %v73_v1, %v85_v16 }
  0x1c   :  { %2519 = vmatpush1.bf16.msra.mxu0 %v3501_v24  ;;  %2551 = vmatpush1.bf16.msra.mxu1 %v3503_v27  ;;  %v3644_v31 = vrot.slane %v73_v1, %v89_v23 }
  0x1d   :  { %233 = vmatprep.mubr.f32.mxu0 %v3203_v2  ;;  %346 = vmatprep.mubr.f32.mxu1 %v3203_v2 }
  0x1e   :  { %2453 = vmatmul.mubr.msk.f32.gmra.mrb[12].mxu0 %vm99_vm1, %v69_v36  ;;  %2463 = vmatmul.mubr.msk.f32.gmra.mrb[12].mxu1 %vm99_vm1, %v69_v36 }
  0x1f   :  { %2521 = vmatprep.subr.bf16.mxu0 %v3532_v37  ;;  %2553 = vmatprep.subr.bf16.mxu1 %v3534_v38 }
  0x20   :  { %2523 = vmatpush1.bf16.msra.mxu0 %v3544_v43  ;;  %2555 = vmatpush1.bf16.msra.mxu1 %v3546_v46 }
  0x21   :  { %239 = vmatprep.mubr.f32.mxu0 %v3203_v2  ;;  %352 = vmatprep.mubr.f32.mxu1 %v3203_v2 }
  0x22   :  { %2454 = vmatmul.mubr.msk.f32.gmra.mrb[14].mxu0 %vm99_vm1, %v70_v55  ;;  %2464 = vmatmul.mubr.msk.f32.gmra.mrb[14].mxu1 %vm99_vm1, %v70_v55 }
  0x23   :  { %2525 = vmatprep.subr.bf16.mxu0 %v3575_v56  ;;  %2557 = vmatprep.subr.bf16.mxu1 %v3577_v59 }
  0x24   :  { %2527 = vmatpush1.bf16.msra.mxu0 %v3581_v60  ;;  %2559 = vmatpush1.bf16.msra.mxu1 %v3583_v61 }
  0x25   :  { %528 = vmatprep.mubr.f32.mxu0 %v3203_v2  ;;  %599 = vmatprep.mubr.f32.mxu1 %v3203_v2 }
  0x26   :  { %2561 = vmatprep.subr.bf16.mxu0 %v3259_v9  ;;  %2593 = vmatprep.subr.bf16.mxu1 %v3272_v13 }
  0x27   :  { %529 = vmatmul.mubr.f32.vlgmr.msra.gmra.mrb[0].mxu0 %v3203_v2  ;;  %600 = vmatmul.mubr.f32.vlgmr.msra.gmra.mrb[0].mxu1 %v3203_v2 }
  0x28   :  { %2563 = vmatpush1.bf16.msra.mxu0 %v3274_v14  ;;  %2595 = vmatpush1.bf16.msra.mxu1 %v3284_v17 }
  0x29   :  { %2565 = vmatprep.subr.bf16.mxu0 %v3311_v25  ;;  %2597 = vmatprep.subr.bf16.mxu1 %v3313_v26 }
  0x2a   :  { %776 = vmatprep.mubr.f32.mxu0 %v3203_v2  ;;  %847 = vmatprep.mubr.f32.mxu1 %v3203_v2 }
  0x2c   :  { %2567 = vmatpush1.bf16.msra.mxu0 %v3323_v29  ;;  %2599 = vmatpush1.bf16.msra.mxu1 %v3325_v30 }
  0x2d   :  { %2569 = vmatprep.subr.bf16.mxu0 %v3360_v40  ;;  %2601 = vmatprep.subr.bf16.mxu1 %v3362_v41 }
  0x30   :  { %2571 = vmatpush1.bf16.msra.mxu0 %v3372_v44  ;;  %2603 = vmatpush1.bf16.msra.mxu1 %v3374_v45 }
  0x31   :  { %2573 = vmatprep.subr.bf16.mxu0 %v3403_v53  ;;  %2605 = vmatprep.subr.bf16.mxu1 %v3405_v54 }
  0x34   :  { %2575 = vmatpush1.bf16.msra.mxu0 %v3415_v57  ;;  %2607 = vmatpush1.bf16.msra.mxu1 %v3417_v58 }
  0x35   :  { %2577 = vmatprep.subr.bf16.mxu0 %v3446_v3  ;;  %2609 = vmatprep.subr.bf16.mxu1 %v3448_v4 }
  0x38   :  { %2579 = vmatpush1.bf16.msra.mxu0 %v3458_v7  ;;  %2611 = vmatpush1.bf16.msra.mxu1 %v3460_v8 }
  0x39   :  { %2581 = vmatprep.subr.bf16.mxu0 %v3489_v20  ;;  %2613 = vmatprep.subr.bf16.mxu1 %v3491_v21 }
  0x3c   :  { %2583 = vmatpush1.bf16.msra.mxu0 %v3501_v24  ;;  %2615 = vmatpush1.bf16.msra.mxu1 %v3503_v27 }
  0x3d   :  { %2585 = vmatprep.subr.bf16.mxu0 %v3532_v37  ;;  %2617 = vmatprep.subr.bf16.mxu1 %v3534_v38 }
  0x40   :  { %2587 = vmatpush1.bf16.msra.mxu0 %v3544_v43  ;;  %2619 = vmatpush1.bf16.msra.mxu1 %v3546_v46 }
  0x41   :  { %2589 = vmatprep.subr.bf16.mxu0 %v3575_v56  ;;  %2621 = vmatprep.subr.bf16.mxu1 %v3577_v59 }
  0x44   :  { %2591 = vmatpush1.bf16.msra.mxu0 %v3581_v60  ;;  %2623 = vmatpush1.bf16.msra.mxu1 %v3583_v61 }
  0x45   :  { %2625 = vmatprep.subr.bf16.mxu0 %v3259_v9  ;;  %2657 = vmatprep.subr.bf16.mxu1 %v3272_v13 }
  0xfa   :  { %v530_v11 = vpop.f32.mrb[0].mxu0  ;;  %v601_v12 = vpop.f32.mrb[0].mxu1 }
  0xfb   :  { %v3008_v15 = vadd.f32 %v530_v11, %v3636_v6  ;;  %v532_v9 = vpop.f32.mrb[1].mxu0  ;;  %v603_v18 = vpop.f32.mrb[1].mxu1  ;;  %v3024_v32 = vadd.f32 %v601_v12, %v3642_v28 }
  0xfc   :  { %v3009_v13 = vadd.f32 %v532_v9, %v3638_v10  ;;  %v3025_v33 = vadd.f32 %v603_v18, %v3644_v31 }
  0xfd   :  { %v2465_v19 = vmul.f32 -1.442695, %v3008_v15  ;;  %v2467_v34 = vmul.f32 -1.442695, %v3024_v32 }
  0xfe   :  { %v2466_v22 = vmul.f32 -1.442695, %v3009_v13 }
  0xff   :  { %3075 = vpow2.f32 %v2465_v19 }
 0x100   :  { %3077 = vpow2.f32 %v2466_v22 }
 0x101   :  { %3079 = vtanh.f32 %v3025_v33 }
 0x102   :  { %3081 = vpow2.f32 %v2467_v34 }
 0x109   :  { %v3076_v35 = vpop.eup %3075 }
 0x10a   :  { %v619_v36 = vadd.f32 1.0, %v3076_v35  ;;  %v3078_v39 = vpop.eup %3077 }
 0x10b   :  { %v620_v42 = vadd.f32 1.0, %v3078_v39  ;;  %v3080_v47 = vpop.eup %3079  ;;  %v1149_v39 = vld [vmem:[%s4250_s2 + $0x8] sm:$0xff] }
 0x10c   :  { %3083 = vrcp.f32 %v619_v36  ;;  %v3082_v48 = vpop.eup %3081 }
 0x10d   :  { %3085 = vrcp.f32 %v620_v42  ;;  %v621_v52 = vadd.f32 1.0, %v3082_v48  ;;  %v1153_v42 = vld [vmem:[%s4250_s2 + $0x28] sm:$0xff] }
 0x10e   :  { %v3708_v48 = vpack.c.bf16 %v1153_v42, %v1149_v39 }
 0x10f   :  { %3087 = vrcp.f32 %v621_v52 }
 0x116   :  { %v3084_v49 = vpop.eup %3083 }
 0x117   :  { %v630_v50 = vmul.f32 %v3084_v49, %v3080_v47  ;;  %v3086_v51 = vpop.eup %3085  ;;  %v1151_v47 = vld [vmem:[%s4250_s2 + $0x18] sm:$0xff] }
 0x118   :  { %v629_v55 = vmul.f32 0.0, %v3086_v51  ;;  %v1155_v49 = vld [vmem:[%s4250_s2 + $0x38] sm:$0xff]  ;;  %v1152_v51 = vld [vmem:[%s4250_s2 + $0x20] sm:$0xff] }
 0x119   :  { %v3088_v63 = vpop.eup %3087  ;;  %v3719_v52 = vpack.c.bf16 %v1155_v49, %v1151_v47 }
 0x11a   :  { %v3648_v62 = vadd.f32 %v630_v50, %v629_v55  ;;  %v1148_v50 = vld [vmem:[%s4250_s2] sm:$0xff] }
 0x11b   :  { %v3721_v55 = vpack.c.bf16 %v1152_v51, %v1148_v50  ;;  %v1427_v50 = vld [vmem:[%s4250_s2 + $0xe8] sm:$0xff]  ;;  %v1425_v51 = vld [vmem:[%s4250_s2 + $0xd8] sm:$0xff] }
 0x11c   :  { %3089 = vtanh.f32 %v3648_v62 }
 0x126   :  { %v3090_v0 = vpop.eup %3089 }
 0x127   :  { %v633_v1 = vmul.f32 %v3090_v0, %v3088_v63  ;;  %v1154_v63 = vld [vmem:[%s4250_s2 + $0x30] sm:$0xff] }
 0x129   :  { %640 = vst [vmem:[%s4252_s4] sm:$0xff] %v633_v1  ;;  %777 = vmatmul.mubr.f32.vlgmr.msra.gmra.mrb[2].mxu0 %v633_v1  ;;  %848 = vmatmul.mubr.f32.vlgmr.msra.gmra.mrb[2].mxu1 %v633_v1  ;;  %v1157_v1 = vld [vmem:[%s4250_s2 + $0x48] sm:$0xff] }
 0x12a   :  { %2627 = vmatpush1.bf16.msra.mxu0 %v3274_v14  ;;  %2659 = vmatpush1.bf16.msra.mxu1 %v3284_v17 }
 0x12b   :  { %2629 = vmatprep.subr.bf16.mxu0 %v3311_v25  ;;  %2661 = vmatprep.subr.bf16.mxu1 %v3313_v26 }
 0x12c   :  { %1026 = vmatprep.mubr.f32.mxu0 %v3203_v2  ;;  %1097 = vmatprep.mubr.f32.mxu1 %v3203_v2 }
 0x12e   :  { %2631 = vmatpush1.bf16.msra.mxu0 %v3323_v29  ;;  %2663 = vmatpush1.bf16.msra.mxu1 %v3325_v30 }
 0x12f   :  { %2633 = vmatprep.subr.bf16.mxu0 %v3360_v40  ;;  %2665 = vmatprep.subr.bf16.mxu1 %v3362_v41 }
 0x132   :  { %2635 = vmatpush1.bf16.msra.mxu0 %v3372_v44  ;;  %2667 = vmatpush1.bf16.msra.mxu1 %v3374_v45 }
 0x133   :  { %2637 = vmatprep.subr.bf16.mxu0 %v3403_v53  ;;  %2669 = vmatprep.subr.bf16.mxu1 %v3405_v54 }
 0x136   :  { %2639 = vmatpush1.bf16.msra.mxu0 %v3415_v57  ;;  %2671 = vmatpush1.bf16.msra.mxu1 %v3417_v58 }
 0x137   :  { %2641 = vmatprep.subr.bf16.mxu0 %v3446_v3  ;;  %2673 = vmatprep.subr.bf16.mxu1 %v3448_v4 }
 0x13a   :  { %2643 = vmatpush1.bf16.msra.mxu0 %v3458_v7  ;;  %2675 = vmatpush1.bf16.msra.mxu1 %v3460_v8 }
 0x13b   :  { %2645 = vmatprep.subr.bf16.mxu0 %v3489_v20  ;;  %2677 = vmatprep.subr.bf16.mxu1 %v3491_v21 }
 0x13e   :  { %2647 = vmatpush1.bf16.msra.mxu0 %v3501_v24  ;;  %2679 = vmatpush1.bf16.msra.mxu1 %v3503_v27 }
 0x13f   :  { %2649 = vmatprep.subr.bf16.mxu0 %v3532_v37  ;;  %2681 = vmatprep.subr.bf16.mxu1 %v3534_v38 }
 0x142   :  { %2651 = vmatpush1.bf16.msra.mxu0 %v3544_v43  ;;  %2683 = vmatpush1.bf16.msra.mxu1 %v3546_v46 }
 0x143   :  { %2653 = vmatprep.subr.bf16.mxu0 %v3575_v56  ;;  %2685 = vmatprep.subr.bf16.mxu1 %v3577_v59 }
 0x146   :  { %2655 = vmatpush1.bf16.msra.mxu0 %v3581_v60  ;;  %2687 = vmatpush1.bf16.msra.mxu1 %v3583_v61 }
 0x147   :  { %2689 = vmatprep.subr.bf16.mxu0 %v3708_v48  ;;  %2721 = vmatprep.subr.bf16.mxu1 %v3719_v52 }
 0x1fc   :  { %v778_v14 = vpop.f32.mrb[2].mxu0  ;;  %v849_v17 = vpop.f32.mrb[2].mxu1 }
 0x1fd   :  { %v3010_v25 = vadd.f32 %v778_v14, %v3636_v6  ;;  %v780_v26 = vpop.f32.mrb[3].mxu0  ;;  %v851_v29 = vpop.f32.mrb[3].mxu1  ;;  %v3026_v44 = vadd.f32 %v849_v17, %v3642_v28  ;;  %v1161_v14 = vld [vmem:[%s4250_s2 + $0x68] sm:$0xff]  ;;  %v1159_v17 = vld [vmem:[%s4250_s2 + $0x58] sm:$0xff] }
 0x1fe   :  { %v3011_v30 = vadd.f32 %v780_v26, %v3638_v10  ;;  %v3027_v45 = vadd.f32 %v851_v29, %v3644_v31  ;;  %v1163_v26 = vld [vmem:[%s4250_s2 + $0x78] sm:$0xff]  ;;  %v1156_v29 = vld [vmem:[%s4250_s2 + $0x40] sm:$0xff] }
 0x1ff   :  { %v2468_v40 = vmul.f32 -1.442695, %v3010_v25  ;;  %v2470_v5 = vmul.f32 -1.442695, %v3026_v44  ;;  %v3744_v25 = vpack.c.bf16 %v1161_v14, %v1157_v1  ;;  %v1158_v44 = vld [vmem:[%s4250_s2 + $0x50] sm:$0xff]  ;;  %v1422_v1 = vld [vmem:[%s4250_s2 + $0xc0] sm:$0xff] }
 0x200   :  { %v2469_v41 = vmul.f32 -1.442695, %v3011_v30  ;;  %v1160_v30 = vld [vmem:[%s4250_s2 + $0x60] sm:$0xff] }
 0x201   :  { %3091 = vpow2.f32 %v2468_v40  ;;  %v3755_v40 = vpack.c.bf16 %v1163_v26, %v1159_v17  ;;  %v1426_v14 = vld [vmem:[%s4250_s2 + $0xe0] sm:$0xff] }
 0x202   :  { %3093 = vpow2.f32 %v2469_v41  ;;  %v3757_v41 = vpack.c.bf16 %v1160_v30, %v1156_v29  ;;  %v3874_v26 = vpack.c.bf16 %v1426_v14, %v1422_v1  ;;  %v1424_v29 = vld [vmem:[%s4250_s2 + $0xd0] sm:$0xff]  ;;  %v1457_v14 = vld [vmem:[%s4250_s2 + $0x1d8] sm:$0xff] }
 0x203   :  { %3095 = vtanh.f32 %v3027_v45  ;;  %v1162_v45 = vld [vmem:[%s4250_s2 + $0x70] sm:$0xff] }
 0x204   :  { %3097 = vpow2.f32 %v2470_v5  ;;  %v3766_v5 = vpack.c.bf16 %v1162_v45, %v1158_v44  ;;  %v1428_v30 = vld [vmem:[%s4250_s2 + $0xf0] sm:$0xff]  ;;  %v1431_v45 = vld [vmem:[%s4250_s2 + $0x108] sm:$0xff] }
 0x205   :  { %v3883_v44 = vpack.c.bf16 %v1428_v30, %v1424_v29  ;;  %v1461_v29 = vld [vmem:[%s4250_s2 + $0x1f8] sm:$0xff]  ;;  %v1454_v30 = vld [vmem:[%s4250_s2 + $0x1c0] sm:$0xff] }
 0x20b   :  { %v3092_v11 = vpop.eup %3091 }
 0x20c   :  { %v867_v12 = vadd.f32 1.0, %v3092_v11  ;;  %v3094_v15 = vpop.eup %3093  ;;  %v1165_v11 = vld [vmem:[%s4250_s2 + $0x88] sm:$0xff] }
 0x20d   :  { %v868_v16 = vadd.f32 1.0, %v3094_v15  ;;  %v3096_v9 = vpop.eup %3095  ;;  %v1167_v15 = vld [vmem:[%s4250_s2 + $0x98] sm:$0xff] }
 0x20e   :  { %3099 = vrcp.f32 %v867_v12  ;;  %v3098_v18 = vpop.eup %3097  ;;  %v1169_v12 = vld [vmem:[%s4250_s2 + $0xa8] sm:$0xff] }
 0x20f   :  { %3101 = vrcp.f32 %v868_v16  ;;  %v869_v23 = vadd.f32 1.0, %v3098_v18  ;;  %v3780_v16 = vpack.c.bf16 %v1169_v12, %v1165_v11  ;;  %v1164_v18 = vld [vmem:[%s4250_s2 + $0x80] sm:$0xff]  ;;  %v1435_v11 = vld [vmem:[%s4250_s2 + $0x128] sm:$0xff]  ;;  %v1433_v12 = vld [vmem:[%s4250_s2 + $0x118] sm:$0xff] }
 0x211   :  { %3103 = vrcp.f32 %v869_v23  ;;  %v1166_v23 = vld [vmem:[%s4250_s2 + $0x90] sm:$0xff] }
 0x218   :  { %v3100_v13 = vpop.eup %3099 }
 0x219   :  { %v878_v19 = vmul.f32 %v3100_v13, %v3096_v9  ;;  %v3102_v22 = vpop.eup %3101  ;;  %v1171_v9 = vld [vmem:[%s4250_s2 + $0xb8] sm:$0xff]  ;;  %v1168_v13 = vld [vmem:[%s4250_s2 + $0xa0] sm:$0xff] }
 0x21a   :  { %v877_v32 = vmul.f32 %v3102_v22, %v3648_v62  ;;  %v1150_v62 = vld [vmem:[%s4250_s2 + $0x10] sm:$0xff]  ;;  %v3793_v22 = vpack.c.bf16 %v1168_v13, %v1164_v18  ;;  %v1430_v18 = vld [vmem:[%s4250_s2 + $0x100] sm:$0xff] }
 0x21b   :  { %v3104_v34 = vpop.eup %3103  ;;  %v3730_v0 = vpack.c.bf16 %v1154_v63, %v1150_v62  ;;  %v1429_v63 = vld [vmem:[%s4250_s2 + $0xf8] sm:$0xff]  ;;  %v1434_v13 = vld [vmem:[%s4250_s2 + $0x120] sm:$0xff] }
 0x21c   :  { %v3691_v33 = vadd.f32 %v878_v19, %v877_v32  ;;  %v3791_v19 = vpack.c.bf16 %v1171_v9, %v1167_v15  ;;  %v1170_v32 = vld [vmem:[%s4250_s2 + $0xb0] sm:$0xff]  ;;  %v3872_v17 = vpack.c.bf16 %v1429_v63, %v1425_v51  ;;  %v3897_v15 = vpack.c.bf16 %v1435_v11, %v1431_v45  ;;  %v1437_v9 = vld [vmem:[%s4250_s2 + $0x138] sm:$0xff]  ;;  %v1459_v51 = vld [vmem:[%s4250_s2 + $0x1e8] sm:$0xff] }
 0x21d   :  { %v4011_v45 = vpack.c.bf16 %v1461_v29, %v1457_v14  ;;  %v1458_v11 = vld [vmem:[%s4250_s2 + $0x1e0] sm:$0xff] }
 0x21e   :  { %3105 = vtanh.f32 %v3691_v33 }
 0x228   :  { %v3106_v35 = vpop.eup %3105 }
 0x229   :  { %v881_v36 = vmul.f32 %v3106_v35, %v3104_v34  ;;  %v3802_v34 = vpack.c.bf16 %v1170_v32, %v1166_v23  ;;  %v3908_v23 = vpack.c.bf16 %v1437_v9, %v1433_v12  ;;  %v3910_v32 = vpack.c.bf16 %v1434_v13, %v1430_v18  ;;  %v1456_v12 = vld [vmem:[%s4250_s2 + $0x1d0] sm:$0xff] }
 0x22a   :  { %v1460_v9 = vld [vmem:[%s4250_s2 + $0x1f0] sm:$0xff]  ;;  %v4023_v18 = vpack.c.bf16 %v1458_v11, %v1454_v30 }
 0x22b   :  { %2471 = vst [vmem:[%s4252_s4 + $0x8] sm:$0xff] %v881_v36  ;;  %1027 = vmatmul.mubr.f32.vlgmr.msra.gmra.mrb[4].mxu0 %v881_v36  ;;  %1098 = vmatmul.mubr.f32.vlgmr.msra.gmra.mrb[4].mxu1 %v881_v36  ;;  %v4027_v13 = vpack.c.bf16 %v1460_v9, %v1456_v12 }
 0x22c   :  { %1276 = vmatprep.mubr.f32.mxu0 %v3203_v2  ;;  %1347 = vmatprep.mubr.f32.mxu1 %v3203_v2 }
 0x22d   :  { %2691 = vmatpush1.bf16.msra.mxu0 %v3721_v55  ;;  %2723 = vmatpush1.bf16.msra.mxu1 %v3730_v0 }
 0x22e   :  { %2693 = vmatprep.subr.bf16.mxu0 %v3744_v25  ;;  %2725 = vmatprep.subr.bf16.mxu1 %v3755_v40 }
 0x231   :  { %2695 = vmatpush1.bf16.msra.mxu0 %v3757_v41  ;;  %2727 = vmatpush1.bf16.msra.mxu1 %v3766_v5 }
 0x232   :  { %2697 = vmatprep.subr.bf16.mxu0 %v3780_v16  ;;  %2729 = vmatprep.subr.bf16.mxu1 %v3791_v19 }
 0x235   :  { %2699 = vmatpush1.bf16.msra.mxu0 %v3793_v22  ;;  %2731 = vmatpush1.bf16.msra.mxu1 %v3802_v34 }
 0x236   :  { %2701 = vmatprep.subr.bf16.mxu0 %v3403_v53  ;;  %2733 = vmatprep.subr.bf16.mxu1 %v3405_v54 }
 0x239   :  { %2703 = vmatpush1.bf16.msra.mxu0 %v3415_v57  ;;  %2735 = vmatpush1.bf16.msra.mxu1 %v3417_v58 }
 0x23a   :  { %2705 = vmatprep.subr.bf16.mxu0 %v3446_v3  ;;  %2737 = vmatprep.subr.bf16.mxu1 %v3448_v4 }
 0x23d   :  { %2707 = vmatpush1.bf16.msra.mxu0 %v3458_v7  ;;  %2739 = vmatpush1.bf16.msra.mxu1 %v3460_v8 }
 0x23e   :  { %2709 = vmatprep.subr.bf16.mxu0 %v3489_v20  ;;  %2741 = vmatprep.subr.bf16.mxu1 %v3491_v21 }
 0x241   :  { %2711 = vmatpush1.bf16.msra.mxu0 %v3501_v24  ;;  %2743 = vmatpush1.bf16.msra.mxu1 %v3503_v27 }
 0x242   :  { %2713 = vmatprep.subr.bf16.mxu0 %v3532_v37  ;;  %2745 = vmatprep.subr.bf16.mxu1 %v3534_v38 }
 0x245   :  { %2715 = vmatpush1.bf16.msra.mxu0 %v3544_v43  ;;  %2747 = vmatpush1.bf16.msra.mxu1 %v3546_v46 }
 0x246   :  { %2717 = vmatprep.subr.bf16.mxu0 %v3575_v56  ;;  %2749 = vmatprep.subr.bf16.mxu1 %v3577_v59 }
 0x249   :  { %2719 = vmatpush1.bf16.msra.mxu0 %v3581_v60  ;;  %2751 = vmatpush1.bf16.msra.mxu1 %v3583_v61 }
 0x24a   :  { %2753 = vmatprep.subr.bf16.mxu0 %v3708_v48  ;;  %2785 = vmatprep.subr.bf16.mxu1 %v3719_v52 }
 0x2fe   :  { %v1028_v53 = vpop.f32.mrb[4].mxu0  ;;  %v1099_v54 = vpop.f32.mrb[4].mxu1 }
 0x2ff   :  { %v3012_v57 = vadd.f32 %v1028_v53, %v3636_v6  ;;  %v1030_v58 = vpop.f32.mrb[5].mxu0  ;;  %v1101_v3 = vpop.f32.mrb[5].mxu1  ;;  %v3028_v20 = vadd.f32 %v1099_v54, %v3642_v28  ;;  %v1432_v53 = vld [vmem:[%s4250_s2 + $0x110] sm:$0xff] }
 0x300   :  { %v3013_v4 = vadd.f32 %v1030_v58, %v3638_v10  ;;  %v3029_v21 = vadd.f32 %v1101_v3, %v3644_v31  ;;  %v1436_v54 = vld [vmem:[%s4250_s2 + $0x130] sm:$0xff]  ;;  %v1439_v58 = vld [vmem:[%s4250_s2 + $0x148] sm:$0xff] }
 0x301   :  { %v2472_v7 = vmul.f32 -1.442695, %v3012_v57  ;;  %v2474_v24 = vmul.f32 -1.442695, %v3028_v20  ;;  %v3919_v57 = vpack.c.bf16 %v1436_v54, %v1432_v53  ;;  %v1443_v3 = vld [vmem:[%s4250_s2 + $0x168] sm:$0xff]  ;;  %v1438_v20 = vld [vmem:[%s4250_s2 + $0x140] sm:$0xff] }
 0x302   :  { %v2473_v8 = vmul.f32 -1.442695, %v3013_v4  ;;  %v1441_v4 = vld [vmem:[%s4250_s2 + $0x158] sm:$0xff] }
 0x303   :  { %3107 = vpow2.f32 %v2472_v7  ;;  %v3933_v7 = vpack.c.bf16 %v1443_v3, %v1439_v58 }
 0x304   :  { %3109 = vpow2.f32 %v2473_v8  ;;  %v1445_v8 = vld [vmem:[%s4250_s2 + $0x178] sm:$0xff] }
 0x305   :  { %3111 = vtanh.f32 %v3029_v21  ;;  %v1442_v21 = vld [vmem:[%s4250_s2 + $0x160] sm:$0xff] }
 0x306   :  { %3113 = vpow2.f32 %v2474_v24  ;;  %v3944_v24 = vpack.c.bf16 %v1445_v8, %v1441_v4 }
 0x30d   :  { %v3108_v27 = vpop.eup %3107 }
 0x30e   :  { %v1117_v37 = vadd.f32 1.0, %v3108_v27  ;;  %v3110_v38 = vpop.eup %3109  ;;  %v3946_v27 = vpack.c.bf16 %v1442_v21, %v1438_v20 }
 0x30f   :  { %v1118_v43 = vadd.f32 1.0, %v3110_v38  ;;  %v3112_v46 = vpop.eup %3111  ;;  %v1444_v38 = vld [vmem:[%s4250_s2 + $0x170] sm:$0xff] }
 0x310   :  { %3115 = vrcp.f32 %v1117_v37  ;;  %v3114_v56 = vpop.eup %3113  ;;  %v1440_v37 = vld [vmem:[%s4250_s2 + $0x150] sm:$0xff] }
 0x311   :  { %3117 = vrcp.f32 %v1118_v43  ;;  %v1119_v35 = vadd.f32 1.0, %v3114_v56  ;;  %v1447_v43 = vld [vmem:[%s4250_s2 + $0x188] sm:$0xff] }
 0x312   :  { %v1451_v56 = vld [vmem:[%s4250_s2 + $0x1a8] sm:$0xff] }
 0x313   :  { %3119 = vrcp.f32 %v1119_v35 }
 0x31a   :  { %v3116_v59 = vpop.eup %3115 }
 0x31b   :  { %v1128_v60 = vmul.f32 %v3116_v59, %v3112_v46  ;;  %v3118_v61 = vpop.eup %3117  ;;  %v3958_v46 = vpack.c.bf16 %v1444_v38, %v1440_v37  ;;  %v1449_v59 = vld [vmem:[%s4250_s2 + $0x198] sm:$0xff] }
 0x31c   :  { %v1127_v36 = vmul.f32 %v3118_v61, %v3691_v33  ;;  %v1423_v33 = vld [vmem:[%s4250_s2 + $0xc8] sm:$0xff]  ;;  %v3971_v61 = vpack.c.bf16 %v1451_v56, %v1447_v43 }
 0x31d   :  { %v3120_v42 = vpop.eup %3119  ;;  %v3861_v62 = vpack.c.bf16 %v1427_v50, %v1423_v33  ;;  %v1452_v33 = vld [vmem:[%s4250_s2 + $0x1b0] sm:$0xff]  ;;  %v1455_v50 = vld [vmem:[%s4250_s2 + $0x1c8] sm:$0xff] }
 0x31e   :  { %v3834_v39 = vadd.f32 %v1128_v60, %v1127_v36  ;;  %v1453_v60 = vld [vmem:[%s4250_s2 + $0x1b8] sm:$0xff]  ;;  %v1446_v36 = vld [vmem:[%s4250_s2 + $0x180] sm:$0xff]  ;;  %v4000_v1 = vpack.c.bf16 %v1459_v51, %v1455_v50 }
 0x31f   :  { %v3973_v35 = vpack.c.bf16 %v1453_v60, %v1449_v59 }
 0x320   :  { %3121 = vtanh.f32 %v3834_v39 }
 0x32a   :  { %v3122_v47 = vpop.eup %3121 }
 0x32b   :  { %v1131_v49 = vmul.f32 %v3122_v47, %v3120_v42  ;;  %v1450_v42 = vld [vmem:[%s4250_s2 + $0x1a0] sm:$0xff]  ;;  %v1448_v47 = vld [vmem:[%s4250_s2 + $0x190] sm:$0xff] }
 0x32c   :  { %v3998_v63 = vpack.c.bf16 %v1452_v33, %v1448_v47 }
 0x32d   :  { %2475 = vst [vmem:[%s4252_s4 + $0x10] sm:$0xff] %v1131_v49  ;;  %1277 = vmatmul.mubr.f32.vlgmr.msra.gmra.mrb[6].mxu0 %v1131_v49  ;;  %1348 = vmatmul.mubr.f32.vlgmr.msra.gmra.mrb[6].mxu1 %v1131_v49  ;;  %v3985_v49 = vpack.c.bf16 %v1450_v42, %v1446_v36 }
 0x32e   :  { %2755 = vmatpush1.bf16.msra.mxu0 %v3721_v55  ;;  %2787 = vmatpush1.bf16.msra.mxu1 %v3730_v0 }
 0x32f   :  { %2757 = vmatprep.subr.bf16.mxu0 %v3744_v25  ;;  %2789 = vmatprep.subr.bf16.mxu1 %v3755_v40 }
 0x330   :  { %1526 = vmatprep.mubr.f32.mxu0 %v3203_v2  ;;  %1597 = vmatprep.mubr.f32.mxu1 %v3203_v2 }
 0x332   :  { %2759 = vmatpush1.bf16.msra.mxu0 %v3757_v41  ;;  %2791 = vmatpush1.bf16.msra.mxu1 %v3766_v5 }
 0x333   :  { %2761 = vmatprep.subr.bf16.mxu0 %v3780_v16  ;;  %2793 = vmatprep.subr.bf16.mxu1 %v3791_v19 }
 0x336   :  { %2763 = vmatpush1.bf16.msra.mxu0 %v3793_v22  ;;  %2795 = vmatpush1.bf16.msra.mxu1 %v3802_v34 }
 0x337   :  { %2765 = vmatprep.subr.bf16.mxu0 %v3861_v62  ;;  %2797 = vmatprep.subr.bf16.mxu1 %v3872_v17 }
 0x33a   :  { %2767 = vmatpush1.bf16.msra.mxu0 %v3874_v26  ;;  %2799 = vmatpush1.bf16.msra.mxu1 %v3883_v44 }
 0x33b   :  { %2769 = vmatprep.subr.bf16.mxu0 %v3897_v15  ;;  %2801 = vmatprep.subr.bf16.mxu1 %v3908_v23 }
 0x33e   :  { %2771 = vmatpush1.bf16.msra.mxu0 %v3910_v32  ;;  %2803 = vmatpush1.bf16.msra.mxu1 %v3919_v57 }
 0x33f   :  { %2773 = vmatprep.subr.bf16.mxu0 %v3933_v7  ;;  %2805 = vmatprep.subr.bf16.mxu1 %v3944_v24 }
 0x342   :  { %2775 = vmatpush1.bf16.msra.mxu0 %v3946_v27  ;;  %2807 = vmatpush1.bf16.msra.mxu1 %v3958_v46 }
 0x343   :  { %2777 = vmatprep.subr.bf16.mxu0 %v3971_v61  ;;  %2809 = vmatprep.subr.bf16.mxu1 %v3973_v35 }
 0x346   :  { %2779 = vmatpush1.bf16.msra.mxu0 %v3985_v49  ;;  %2811 = vmatpush1.bf16.msra.mxu1 %v3998_v63 }
 0x347   :  { %2781 = vmatprep.subr.bf16.mxu0 %v4000_v1  ;;  %2813 = vmatprep.subr.bf16.mxu1 %v4011_v45 }
 0x34a   :  { %2783 = vmatpush1.bf16.msra.mxu0 %v4023_v18  ;;  %2815 = vmatpush1.bf16.msra.mxu1 %v4027_v13 }
 0x34b   :  { %2817 = vmatprep.subr.bf16.mxu0 %v3708_v48  ;;  %2849 = vmatprep.subr.bf16.mxu1 %v3719_v52 }
 0x400   :  { %v1278_v53 = vpop.f32.mrb[6].mxu0  ;;  %v1349_v54 = vpop.f32.mrb[6].mxu1 }
 0x401   :  { %v3014_v58 = vadd.f32 %v1278_v53, %v3636_v6  ;;  %v1280_v3 = vpop.f32.mrb[7].mxu0  ;;  %v1351_v4 = vpop.f32.mrb[7].mxu1  ;;  %v3030_v37 = vadd.f32 %v1349_v54, %v3642_v28 }
 0x402   :  { %v3015_v8 = vadd.f32 %v1280_v3, %v3638_v10  ;;  %v3031_v38 = vadd.f32 %v1351_v4, %v3644_v31 }
 0x403   :  { %v2476_v20 = vmul.f32 -1.442695, %v3014_v58  ;;  %v2478_v43 = vmul.f32 -1.442695, %v3030_v37 }
 0x404   :  { %v2477_v21 = vmul.f32 -1.442695, %v3015_v8 }
 0x405   :  { %3123 = vpow2.f32 %v2476_v20 }
 0x406   :  { %3125 = vpow2.f32 %v2477_v21 }
 0x407   :  { %3127 = vtanh.f32 %v3031_v38 }
 0x408   :  { %3129 = vpow2.f32 %v2478_v43 }
 0x40f   :  { %v3124_v56 = vpop.eup %3123 }
 0x410   :  { %v1367_v59 = vadd.f32 1.0, %v3124_v56  ;;  %v3126_v60 = vpop.eup %3125 }
 0x411   :  { %v1368_v36 = vadd.f32 1.0, %v3126_v60  ;;  %v3128_v42 = vpop.eup %3127 }
 0x412   :  { %3131 = vrcp.f32 %v1367_v59  ;;  %v3130_v47 = vpop.eup %3129 }
 0x413   :  { %3133 = vrcp.f32 %v1368_v36  ;;  %v1369_v14 = vadd.f32 1.0, %v3130_v47 }
 0x415   :  { %3135 = vrcp.f32 %v1369_v14 }
 0x41c   :  { %v3132_v33 = vpop.eup %3131 }
 0x41d   :  { %v1378_v50 = vmul.f32 %v3132_v33, %v3128_v42  ;;  %v3134_v51 = vpop.eup %3133 }
 0x41e   :  { %v1377_v29 = vmul.f32 %v3134_v51, %v3834_v39 }
 0x41f   :  { %v3136_v11 = vpop.eup %3135 }
 0x420   :  { %v4039_v30 = vadd.f32 %v1378_v50, %v1377_v29 }
 0x422   :  { %3137 = vtanh.f32 %v4039_v30 }
 0x42c   :  { %v3138_v12 = vpop.eup %3137 }
 0x42d   :  { %v1381_v9 = vmul.f32 %v3138_v12, %v3136_v11 }
 0x42f   :  { %2479 = vst [vmem:[%s4252_s4 + $0x18] sm:$0xff] %v1381_v9  ;;  %1527 = vmatmul.mubr.f32.vlgmr.msra.gmra.mrb[8].mxu0 %v1381_v9  ;;  %1598 = vmatmul.mubr.f32.vlgmr.msra.gmra.mrb[8].mxu1 %v1381_v9 }
 0x430   :  { %2819 = vmatpush1.bf16.msra.mxu0 %v3721_v55  ;;  %2851 = vmatpush1.bf16.msra.mxu1 %v3730_v0 }
 0x431   :  { %2821 = vmatprep.subr.bf16.mxu0 %v3744_v25  ;;  %2853 = vmatprep.subr.bf16.mxu1 %v3755_v40 }
 0x432   :  { %1776 = vmatprep.mubr.f32.mxu0 %v3203_v2  ;;  %1847 = vmatprep.mubr.f32.mxu1 %v3203_v2 }
 0x434   :  { %2823 = vmatpush1.bf16.msra.mxu0 %v3757_v41  ;;  %2855 = vmatpush1.bf16.msra.mxu1 %v3766_v5 }
 0x435   :  { %2825 = vmatprep.subr.bf16.mxu0 %v3780_v16  ;;  %2857 = vmatprep.subr.bf16.mxu1 %v3791_v19 }
 0x438   :  { %2827 = vmatpush1.bf16.msra.mxu0 %v3793_v22  ;;  %2859 = vmatpush1.bf16.msra.mxu1 %v3802_v34 }
 0x439   :  { %2829 = vmatprep.subr.bf16.mxu0 %v3861_v62  ;;  %2861 = vmatprep.subr.bf16.mxu1 %v3872_v17 }
 0x43c   :  { %2831 = vmatpush1.bf16.msra.mxu0 %v3874_v26  ;;  %2863 = vmatpush1.bf16.msra.mxu1 %v3883_v44 }
 0x43d   :  { %2833 = vmatprep.subr.bf16.mxu0 %v3897_v15  ;;  %2865 = vmatprep.subr.bf16.mxu1 %v3908_v23 }
 0x440   :  { %2835 = vmatpush1.bf16.msra.mxu0 %v3910_v32  ;;  %2867 = vmatpush1.bf16.msra.mxu1 %v3919_v57 }
 0x441   :  { %2837 = vmatprep.subr.bf16.mxu0 %v3933_v7  ;;  %2869 = vmatprep.subr.bf16.mxu1 %v3944_v24 }
 0x444   :  { %2839 = vmatpush1.bf16.msra.mxu0 %v3946_v27  ;;  %2871 = vmatpush1.bf16.msra.mxu1 %v3958_v46 }
 0x445   :  { %2841 = vmatprep.subr.bf16.mxu0 %v3971_v61  ;;  %2873 = vmatprep.subr.bf16.mxu1 %v3973_v35 }
 0x448   :  { %2843 = vmatpush1.bf16.msra.mxu0 %v3985_v49  ;;  %2875 = vmatpush1.bf16.msra.mxu1 %v3998_v63 }
 0x449   :  { %2845 = vmatprep.subr.bf16.mxu0 %v4000_v1  ;;  %2877 = vmatprep.subr.bf16.mxu1 %v4011_v45 }
 0x44c   :  { %2847 = vmatpush1.bf16.msra.mxu0 %v4023_v18  ;;  %2879 = vmatpush1.bf16.msra.mxu1 %v4027_v13 }
 0x44d   :  { %2881 = vmatprep.subr.bf16.mxu0 %v3708_v48  ;;  %2913 = vmatprep.subr.bf16.mxu1 %v3719_v52 }
 0x502   :  { %v1528_v39 = vpop.f32.mrb[8].mxu0  ;;  %v1599_v53 = vpop.f32.mrb[8].mxu1 }
 0x503   :  { %v3016_v54 = vadd.f32 %v1528_v39, %v3636_v6  ;;  %v1530_v58 = vpop.f32.mrb[9].mxu0  ;;  %v1601_v3 = vpop.f32.mrb[9].mxu1  ;;  %v3032_v21 = vadd.f32 %v1599_v53, %v3642_v28 }
 0x504   :  { %v3017_v4 = vadd.f32 %v1530_v58, %v3638_v10  ;;  %v3033_v37 = vadd.f32 %v1601_v3, %v3644_v31 }
 0x505   :  { %v2480_v8 = vmul.f32 -1.442695, %v3016_v54  ;;  %v2482_v38 = vmul.f32 -1.442695, %v3032_v21 }
 0x506   :  { %v2481_v20 = vmul.f32 -1.442695, %v3017_v4 }
 0x507   :  { %3139 = vpow2.f32 %v2480_v8 }
 0x508   :  { %3141 = vpow2.f32 %v2481_v20 }
 0x509   :  { %3143 = vtanh.f32 %v3033_v37 }
 0x50a   :  { %3145 = vpow2.f32 %v2482_v38 }
 0x511   :  { %v3140_v48 = vpop.eup %3139 }
 0x512   :  { %v1617_v43 = vadd.f32 1.0, %v3140_v48  ;;  %v3142_v52 = vpop.eup %3141 }
 0x513   :  { %v1618_v56 = vadd.f32 1.0, %v3142_v52  ;;  %v3144_v59 = vpop.eup %3143  ;;  %v2149_v52 = vld [vmem:[%s4250_s2 + $0x8] sm:$0xff] }
 0x514   :  { %3147 = vrcp.f32 %v1617_v43  ;;  %v3146_v60 = vpop.eup %3145 }
 0x515   :  { %3149 = vrcp.f32 %v1618_v56  ;;  %v1619_v33 = vadd.f32 1.0, %v3146_v60  ;;  %v2153_v56 = vld [vmem:[%s4250_s2 + $0x28] sm:$0xff] }
 0x516   :  { %v2944_v60 = vpack.c.bf16 %v2153_v56, %v2149_v52 }
 0x517   :  { %3151 = vrcp.f32 %v1619_v33 }
 0x51e   :  { %v3148_v36 = vpop.eup %3147 }
 0x51f   :  { %v1628_v42 = vmul.f32 %v3148_v36, %v3144_v59  ;;  %v3150_v47 = vpop.eup %3149  ;;  %v2151_v59 = vld [vmem:[%s4250_s2 + $0x18] sm:$0xff] }
 0x520   :  { %v1627_v50 = vmul.f32 %v3150_v47, %v4039_v30  ;;  %v2155_v36 = vld [vmem:[%s4250_s2 + $0x38] sm:$0xff] }
 0x521   :  { %v3152_v14 = vpop.eup %3151  ;;  %v2976_v47 = vpack.c.bf16 %v2155_v36, %v2151_v59 }
 0x522   :  { %v4084_v51 = vadd.f32 %v1628_v42, %v1627_v50  ;;  %v2152_v42 = vld [vmem:[%s4250_s2 + $0x20] sm:$0xff]  ;;  %v2150_v50 = vld [vmem:[%s4250_s2 + $0x10] sm:$0xff] }
 0x524   :  { %3153 = vtanh.f32 %v4084_v51 }
 0x52e   :  { %v3154_v29 = vpop.eup %3153 }
 0x52f   :  { %v1631_v11 = vmul.f32 %v3154_v29, %v3152_v14  ;;  %v2157_v29 = vld [vmem:[%s4250_s2 + $0x48] sm:$0xff] }
 0x531   :  { %2483 = vst [vmem:[%s4252_s4 + $0x20] sm:$0xff] %v1631_v11  ;;  %1777 = vmatmul.mubr.f32.vlgmr.msra.gmra.mrb[10].mxu0 %v1631_v11  ;;  %1848 = vmatmul.mubr.f32.vlgmr.msra.gmra.mrb[10].mxu1 %v1631_v11  ;;  %v2161_v11 = vld [vmem:[%s4250_s2 + $0x68] sm:$0xff] }
 0x532   :  { %2883 = vmatpush1.bf16.msra.mxu0 %v3721_v55  ;;  %2915 = vmatpush1.bf16.msra.mxu1 %v3730_v0 }
 0x533   :  { %2885 = vmatprep.subr.bf16.mxu0 %v3744_v25  ;;  %2917 = vmatprep.subr.bf16.mxu1 %v3755_v40 }
 0x534   :  { %2026 = vmatprep.mubr.f32.mxu0 %v3203_v2  ;;  %2097 = vmatprep.mubr.f32.mxu1 %v3203_v2 }
 0x536   :  { %2887 = vmatpush1.bf16.msra.mxu0 %v3757_v41  ;;  %2919 = vmatpush1.bf16.msra.mxu1 %v3766_v5 }
 0x537   :  { %2889 = vmatprep.subr.bf16.mxu0 %v3780_v16  ;;  %2921 = vmatprep.subr.bf16.mxu1 %v3791_v19 }
 0x53a   :  { %2891 = vmatpush1.bf16.msra.mxu0 %v3793_v22  ;;  %2923 = vmatpush1.bf16.msra.mxu1 %v3802_v34 }
 0x53b   :  { %2893 = vmatprep.subr.bf16.mxu0 %v3861_v62  ;;  %2925 = vmatprep.subr.bf16.mxu1 %v3872_v17 }
 0x53e   :  { %2895 = vmatpush1.bf16.msra.mxu0 %v3874_v26  ;;  %2927 = vmatpush1.bf16.msra.mxu1 %v3883_v44 }
 0x53f   :  { %2897 = vmatprep.subr.bf16.mxu0 %v3897_v15  ;;  %2929 = vmatprep.subr.bf16.mxu1 %v3908_v23 }
 0x542   :  { %2899 = vmatpush1.bf16.msra.mxu0 %v3910_v32  ;;  %2931 = vmatpush1.bf16.msra.mxu1 %v3919_v57 }
 0x543   :  { %2901 = vmatprep.subr.bf16.mxu0 %v3933_v7  ;;  %2933 = vmatprep.subr.bf16.mxu1 %v3944_v24 }
 0x546   :  { %2903 = vmatpush1.bf16.msra.mxu0 %v3946_v27  ;;  %2935 = vmatpush1.bf16.msra.mxu1 %v3958_v46 }
 0x547   :  { %2905 = vmatprep.subr.bf16.mxu0 %v3971_v61  ;;  %2937 = vmatprep.subr.bf16.mxu1 %v3973_v35 }
 0x54a   :  { %2907 = vmatpush1.bf16.msra.mxu0 %v3985_v49  ;;  %2939 = vmatpush1.bf16.msra.mxu1 %v3998_v63 }
 0x54b   :  { %2909 = vmatprep.subr.bf16.mxu0 %v4000_v1  ;;  %2941 = vmatprep.subr.bf16.mxu1 %v4011_v45 }
 0x54e   :  { %2911 = vmatpush1.bf16.msra.mxu0 %v4023_v18  ;;  %2943 = vmatpush1.bf16.msra.mxu1 %v4027_v13 }
 0x54f   :  { %2945 = vmatprep.subr.bf16.mxu0 %v2944_v60  ;;  %2977 = vmatprep.subr.bf16.mxu1 %v2976_v47 }
 0x604   :  { %v1778_v55 = vpop.f32.mrb[10].mxu0  ;;  %v1849_v0 = vpop.f32.mrb[10].mxu1 }
 0x605   :  { %v3018_v25 = vadd.f32 %v1778_v55, %v3636_v6  ;;  %v1780_v40 = vpop.f32.mrb[11].mxu0  ;;  %v1851_v41 = vpop.f32.mrb[11].mxu1  ;;  %v3034_v22 = vadd.f32 %v1849_v0, %v3642_v28  ;;  %v2159_v55 = vld [vmem:[%s4250_s2 + $0x58] sm:$0xff]  ;;  %v2948_v0 = vpack.c.bf16 %v2161_v11, %v2157_v29 }
 0x606   :  { %v3019_v5 = vadd.f32 %v1780_v40, %v3638_v10  ;;  %v3035_v34 = vadd.f32 %v1851_v41, %v3644_v31  ;;  %v2156_v40 = vld [vmem:[%s4250_s2 + $0x40] sm:$0xff] }
 0x607   :  { %v2484_v16 = vmul.f32 -1.442695, %v3018_v25  ;;  %v2486_v30 = vmul.f32 -1.442695, %v3034_v22  ;;  %v2163_v25 = vld [vmem:[%s4250_s2 + $0x78] sm:$0xff]  ;;  %v2160_v41 = vld [vmem:[%s4250_s2 + $0x60] sm:$0xff] }
 0x608   :  { %v2485_v19 = vmul.f32 -1.442695, %v3019_v5  ;;  %v2980_v5 = vpack.c.bf16 %v2163_v25, %v2159_v55  ;;  %v2162_v22 = vld [vmem:[%s4250_s2 + $0x70] sm:$0xff] }
 0x609   :  { %3155 = vpow2.f32 %v2484_v16  ;;  %v2950_v16 = vpack.c.bf16 %v2160_v41, %v2156_v40 }
 0x60a   :  { %3157 = vpow2.f32 %v2485_v19  ;;  %v2158_v19 = vld [vmem:[%s4250_s2 + $0x50] sm:$0xff] }
 0x60b   :  { %3159 = vtanh.f32 %v3035_v34  ;;  %v2982_v34 = vpack.c.bf16 %v2162_v22, %v2158_v19 }
 0x60c   :  { %3161 = vpow2.f32 %v2486_v30  ;;  %v2165_v30 = vld [vmem:[%s4250_s2 + $0x88] sm:$0xff] }
 0x613   :  { %v3156_v12 = vpop.eup %3155 }
 0x614   :  { %v1867_v9 = vadd.f32 1.0, %v3156_v12  ;;  %v3158_v39 = vpop.eup %3157  ;;  %v2169_v12 = vld [vmem:[%s4250_s2 + $0xa8] sm:$0xff] }
 0x615   :  { %v1868_v53 = vadd.f32 1.0, %v3158_v39  ;;  %v3160_v54 = vpop.eup %3159  ;;  %v2952_v39 = vpack.c.bf16 %v2169_v12, %v2165_v30 }
 0x616   :  { %3163 = vrcp.f32 %v1867_v9  ;;  %v3162_v58 = vpop.eup %3161  ;;  %v2167_v9 = vld [vmem:[%s4250_s2 + $0x98] sm:$0xff] }
 0x617   :  { %3165 = vrcp.f32 %v1868_v53  ;;  %v1869_v20 = vadd.f32 1.0, %v3162_v58  ;;  %v2171_v53 = vld [vmem:[%s4250_s2 + $0xb8] sm:$0xff]  ;;  %v2168_v58 = vld [vmem:[%s4250_s2 + $0xa0] sm:$0xff] }
 0x619   :  { %3167 = vrcp.f32 %v1869_v20  ;;  %v2170_v20 = vld [vmem:[%s4250_s2 + $0xb0] sm:$0xff] }
 0x620   :  { %v3164_v3 = vpop.eup %3163 }
 0x621   :  { %v1878_v4 = vmul.f32 %v3164_v3, %v3160_v54  ;;  %v3166_v8 = vpop.eup %3165  ;;  %v2164_v54 = vld [vmem:[%s4250_s2 + $0x80] sm:$0xff]  ;;  %v2984_v3 = vpack.c.bf16 %v2171_v53, %v2167_v9 }
 0x622   :  { %v1877_v21 = vmul.f32 %v3166_v8, %v4084_v51  ;;  %v2154_v51 = vld [vmem:[%s4250_s2 + $0x30] sm:$0xff] }
 0x623   :  { %v3168_v38 = vpop.eup %3167  ;;  %v2978_v14 = vpack.c.bf16 %v2154_v51, %v2150_v50  ;;  %v2166_v8 = vld [vmem:[%s4250_s2 + $0x90] sm:$0xff] }
 0x624   :  { %v4127_v37 = vadd.f32 %v1878_v4, %v1877_v21  ;;  %v2954_v4 = vpack.c.bf16 %v2168_v58, %v2164_v54  ;;  %v2986_v21 = vpack.c.bf16 %v2170_v20, %v2166_v8 }
 0x626   :  { %3169 = vtanh.f32 %v4127_v37 }
 0x630   :  { %v3170_v48 = vpop.eup %3169 }
 0x631   :  { %v1881_v43 = vmul.f32 %v3170_v48, %v3168_v38 }
 0x633   :  { %2487 = vst [vmem:[%s4252_s4 + $0x28] sm:$0xff] %v1881_v43  ;;  %2027 = vmatmul.mubr.f32.vlgmr.msra.gmra.mrb[12].mxu0 %v1881_v43  ;;  %2098 = vmatmul.mubr.f32.vlgmr.msra.gmra.mrb[12].mxu1 %v1881_v43 }
 0x634   :  { %2276 = vmatprep.mubr.f32.mxu0 %v3203_v2  ;;  %2347 = vmatprep.mubr.f32.mxu1 %v3203_v2  ;;  %v2148_v2 = vld [vmem:[%s4250_s2] sm:$0xff] }
 0x635   :  { %v2946_v33 = vpack.c.bf16 %v2152_v42, %v2148_v2  ;;  %2979 = vmatpush1.bf16.msra.mxu1 %v2978_v14 }
 0x636   :  { %2981 = vmatprep.subr.bf16.mxu1 %v2980_v5 }
 0x637   :  { %2947 = vmatpush1.bf16.msra.mxu0 %v2946_v33 }
 0x638   :  { %2949 = vmatprep.subr.bf16.mxu0 %v2948_v0 }
 0x639   :  { %2983 = vmatpush1.bf16.msra.mxu1 %v2982_v34 }
 0x63a   :  { %2985 = vmatprep.subr.bf16.mxu1 %v2984_v3 }
 0x63b   :  { %2951 = vmatpush1.bf16.msra.mxu0 %v2950_v16 }
 0x63c   :  { %2953 = vmatprep.subr.bf16.mxu0 %v2952_v39 }
 0x63d   :  { %2987 = vmatpush1.bf16.msra.mxu1 %v2986_v21 }
 0x63e   :  { %2989 = vmatprep.subr.bf16.mxu1 %v3872_v17 }
 0x63f   :  { %2955 = vmatpush1.bf16.msra.mxu0 %v2954_v4 }
 0x640   :  { %2957 = vmatprep.subr.bf16.mxu0 %v3861_v62 }
 0x641   :  { %2991 = vmatpush1.bf16.msra.mxu1 %v3883_v44 }
 0x642   :  { %2993 = vmatprep.subr.bf16.mxu1 %v3908_v23 }
 0x643   :  { %2959 = vmatpush1.bf16.msra.mxu0 %v3874_v26 }
 0x644   :  { %2961 = vmatprep.subr.bf16.mxu0 %v3897_v15 }
 0x645   :  { %2995 = vmatpush1.bf16.msra.mxu1 %v3919_v57 }
 0x646   :  { %2997 = vmatprep.subr.bf16.mxu1 %v3944_v24 }
 0x647   :  { %2963 = vmatpush1.bf16.msra.mxu0 %v3910_v32 }
 0x648   :  { %2965 = vmatprep.subr.bf16.mxu0 %v3933_v7 }
 0x649   :  { %2999 = vmatpush1.bf16.msra.mxu1 %v3958_v46 }
 0x64a   :  { %3001 = vmatprep.subr.bf16.mxu1 %v3973_v35 }
 0x64b   :  { %2967 = vmatpush1.bf16.msra.mxu0 %v3946_v27 }
 0x64c   :  { %2969 = vmatprep.subr.bf16.mxu0 %v3971_v61 }
 0x64d   :  { %3003 = vmatpush1.bf16.msra.mxu1 %v3998_v63 }
 0x64e   :  { %3005 = vmatprep.subr.bf16.mxu1 %v4011_v45 }
 0x64f   :  { %2971 = vmatpush1.bf16.msra.mxu0 %v3985_v49 }
 0x650   :  { %2973 = vmatprep.subr.bf16.mxu0 %v4000_v1 }
 0x651   :  { %3007 = vmatpush1.bf16.msra.mxu1 %v4027_v13 }
 0x653   :  { %2975 = vmatpush1.bf16.msra.mxu0 %v4023_v18 }
 0x706   :  { %v2028_v62 = vpop.f32.mrb[12].mxu0  ;;  %v2099_v17 = vpop.f32.mrb[12].mxu1 }
 0x707   :  { %v3020_v26 = vadd.f32 %v2028_v62, %v3636_v6  ;;  %v2030_v44 = vpop.f32.mrb[13].mxu0  ;;  %v2101_v15 = vpop.f32.mrb[13].mxu1  ;;  %v3036_v7 = vadd.f32 %v2099_v17, %v3642_v28 }
 0x708   :  { %v3021_v23 = vadd.f32 %v2030_v44, %v3638_v10  ;;  %v3037_v24 = vadd.f32 %v2101_v15, %v3644_v31 }
 0x709   :  { %v2488_v32 = vmul.f32 -1.442695, %v3020_v26  ;;  %v2490_v27 = vmul.f32 -1.442695, %v3036_v7 }
 0x70a   :  { %v2489_v57 = vmul.f32 -1.442695, %v3021_v23 }
 0x70b   :  { %3171 = vpow2.f32 %v2488_v32 }
 0x70c   :  { %3173 = vpow2.f32 %v2489_v57 }
 0x70d   :  { %3175 = vtanh.f32 %v3037_v24 }
 0x70e   :  { %3177 = vpow2.f32 %v2490_v27 }
 0x715   :  { %v3172_v46 = vpop.eup %3171 }
 0x716   :  { %v2117_v61 = vadd.f32 1.0, %v3172_v46  ;;  %v3174_v35 = vpop.eup %3173 }
 0x717   :  { %v2118_v49 = vadd.f32 1.0, %v3174_v35  ;;  %v3176_v63 = vpop.eup %3175 }
 0x718   :  { %3179 = vrcp.f32 %v2117_v61  ;;  %v3178_v1 = vpop.eup %3177 }
 0x719   :  { %3181 = vrcp.f32 %v2118_v49  ;;  %v2119_v38 = vadd.f32 1.0, %v3178_v1 }
 0x71b   :  { %3183 = vrcp.f32 %v2119_v38 }
 0x722   :  { %v3180_v45 = vpop.eup %3179 }
 0x723   :  { %v2128_v18 = vmul.f32 %v3180_v45, %v3176_v63  ;;  %v3182_v13 = vpop.eup %3181 }
 0x724   :  { %v2127_v48 = vmul.f32 %v3182_v13, %v4127_v37 }
 0x725   :  { %v3184_v52 = vpop.eup %3183 }
 0x726   :  { %v2129_v43 = vadd.f32 %v2128_v18, %v2127_v48 }
 0x728   :  { %3185 = vtanh.f32 %v2129_v43 }
 0x732   :  { %v3186_v56 = vpop.eup %3185 }
 0x733   :  { %v2131_v59 = vmul.f32 %v3186_v56, %v3184_v52 }
 0x735   :  { %2491 = vst [vmem:[%s4252_s4 + $0x30] sm:$0xff] %v2131_v59  ;;  %2277 = vmatmul.mubr.f32.vlgmr.msra.gmra.mrb[14].mxu0 %v2131_v59  ;;  %2348 = vmatmul.mubr.f32.vlgmr.msra.gmra.mrb[14].mxu1 %v2131_v59 }
 0x808   :  { %v2278_v60 = vpop.f32.mrb[14].mxu0  ;;  %v2349_v36 = vpop.f32.mrb[14].mxu1 }
 0x809   :  { %v3022_v2 = vadd.f32 %v2278_v60, %v3636_v6  ;;  %v2280_v42 = vpop.f32.mrb[15].mxu0  ;;  %v2351_v47 = vpop.f32.mrb[15].mxu1  ;;  %v3038_v51 = vadd.f32 %v2349_v36, %v3642_v28 }
 0x80a   :  { %v3023_v37 = vadd.f32 %v2280_v42, %v3638_v10  ;;  %v3039_v14 = vadd.f32 %v2351_v47, %v3644_v31 }
 0x80b   :  { %v2492_v33 = vmul.f32 -1.442695, %v3022_v2  ;;  %v2494_v29 = vmul.f32 -1.442695, %v3038_v51 }
 0x80c   :  { %v2493_v50 = vmul.f32 -1.442695, %v3023_v37 }
 0x80d   :  { %3187 = vpow2.f32 %v2492_v33 }
 0x80e   :  { %3189 = vpow2.f32 %v2493_v50 }
 0x80f   :  { %3191 = vtanh.f32 %v3039_v14 }
 0x810   :  { %3193 = vpow2.f32 %v2494_v29 }
 0x817   :  { %v3188_v11 = vpop.eup %3187 }
 0x818   :  { %v2367_v55 = vadd.f32 1.0, %v3188_v11  ;;  %v3190_v0 = vpop.eup %3189 }
 0x819   :  { %v2368_v6 = vadd.f32 1.0, %v3190_v0  ;;  %v3192_v25 = vpop.eup %3191 }
 0x81a   :  { %3195 = vrcp.f32 %v2367_v55  ;;  %v3194_v40 = vpop.eup %3193 }
 0x81b   :  { %3197 = vrcp.f32 %v2368_v6  ;;  %v2369_v16 = vadd.f32 1.0, %v3194_v40 }
 0x81d   :  { %3199 = vrcp.f32 %v2369_v16 }
 0x824   :  { %v3196_v10 = vpop.eup %3195 }
 0x825   :  { %v2378_v41 = vmul.f32 %v3196_v10, %v3192_v25  ;;  %v3198_v5 = vpop.eup %3197 }
 0x826   :  { %v2377_v19 = vmul.f32 %v3198_v5, %v2129_v43 }
 0x827   :  { %v3200_v28 = vpop.eup %3199 }
 0x828   :  { %v2379_v22 = vadd.f32 %v2378_v41, %v2377_v19 }
 0x82a   :  { %3201 = vtanh.f32 %v2379_v22  ;;  %2397 = vst [vmem:[%s4253_s6] sm:$0xff] %v2379_v22 }
 0x834   :  { %v3202_v31 = vpop.eup %3201 }
 0x835   :  { %v2381_v34 = vmul.f32 %v3202_v31, %v3200_v28 }
 0x837   :  { %2495 = vst [vmem:[%s4252_s4 + $0x38] sm:$0xff] %v2381_v34  ;;  %2396 = vst [vmem:[%s4254_s5] sm:$0xff] %v2381_v34 }

</bundles_post_ra>
